<compile_context>
chip_gen: v7x
topology: tpu7x:2x2x1
jax: 0.10.0
libtpu: 0.0.40
codegen_flags: <defaults>
</compile_context>

<pallas_src>
import functools

import jax
import jax.numpy as jnp
from jax import lax
from jax.experimental import pallas as pl
from jax.experimental.pallas import tpu as pltpu


def _ncds_jacobian_kernel(x_ref, w1_ref, b1_ref, w2_ref, b2_ref, eps_eye_ref,
                          out_ref, *, d):
    # x_ref:      (TB, d)       block of input vectors
    # w1_ref:     (d, h)        b1_ref: (1, h)
    # w2_ref:     (h, d*d)      b2_ref: (1, d*d)
    # eps_eye_ref:(1, d*d)      flattened eps * I(d)
    # out_ref:    (TB, d*d)     lane-dense flat output
    tb = x_ref.shape[0]

    x = x_ref[...]                                                   # (TB, d)

    # MLP: tanh(x @ W1 + b1) @ W2 + b2 -> one flat Jacobian row per sample.
    h = jnp.tanh(
        jnp.dot(x, w1_ref[...], preferred_element_type=jnp.float32) + b1_ref[...]
    )                                                                # (TB, h)
    y = jnp.dot(h, w2_ref[...], preferred_element_type=jnp.float32) + b2_ref[...]
    J = y.reshape(tb, d, d)                                          # (TB, d, d)

    # Batched J^T @ J without materializing J.T: contract the row axis (1) of
    # both operands, batch over axis 0.
    g = lax.dot_general(
        J, J,
        dimension_numbers=(((1,), (1,)), ((0,), (0,))),
        preferred_element_type=jnp.float32,
    )                                                                # (TB, d, d)

    # r = -G - eps*I, stored lane-dense as (TB, d*d).
    out_ref[...] = -g.reshape(tb, d * d) - eps_eye_ref[...]


def _round_up(x, m):
    return ((x + m - 1) // m) * m


def _choose_block_b(batch, block_b_max):
    bb = min(block_b_max, _round_up(batch, 8))
    if batch > 8:
        # Keep >= 2 grid steps so the "parallel" batch axis can shard across
        # both v7x TensorCores (harmless on single-TC v5e/v6e).
        bb = min(bb, _round_up((batch + 1) // 2, 8))
    return max(bb, 8)


def ncds_jacobian_batched(xs, w1, b1, w2, b2, *, eps=0.01, block_b=256):
    """xs: (B, d) float32. Returns (B, d, d) float32; row i matches the
    PyTorch module's forward(xs[i])."""
    B, d = xs.shape
    hidden = w1.shape[1]
    assert w1.shape == (d, hidden)
    assert w2.shape == (hidden, d * d)

    bb = _choose_block_b(B, block_b)
    B_pad = _round_up(B, bb)
    if B_pad != B:
        xs = jnp.pad(xs, ((0, B_pad - B), (0, 0)))

    b1_2 = b1.reshape(1, hidden)
    b2_2 = b2.reshape(1, d * d)
    eps_eye = (jnp.float32(eps) * jnp.eye(d, dtype=jnp.float32)).reshape(1, d * d)

    kernel = functools.partial(_ncds_jacobian_kernel, d=d)

    # Advisory scheduling hint for XLA around this latency-bound kernel.
    flops = B_pad * (2 * d * hidden + 2 * hidden * d * d + 2 * d * d * d)
    bytes_accessed = 4 * (
        B_pad * d + w1.size + b1.size + w2.size + b2.size + d * d + B_pad * d * d
    )
    cost = pl.CostEstimate(
        flops=flops, transcendentals=B_pad * hidden, bytes_accessed=bytes_accessed
    )

    out_flat = pl.pallas_call(
        kernel,
        out_shape=jax.ShapeDtypeStruct((B_pad, d * d), jnp.float32),
        grid_spec=pltpu.PrefetchScalarGridSpec(
            num_scalar_prefetch=0,
            grid=(B_pad // bb,),
            in_specs=[
                pl.BlockSpec((bb, d), lambda b: (b, 0)),             # x: tiled over batch
                pl.BlockSpec((d, hidden), lambda b: (0, 0)),         # W1: resident
                pl.BlockSpec((1, hidden), lambda b: (0, 0)),         # b1: resident
                pl.BlockSpec((hidden, d * d), lambda b: (0, 0)),     # W2: resident
                pl.BlockSpec((1, d * d), lambda b: (0, 0)),          # b2: resident
                pl.BlockSpec((1, d * d), lambda b: (0, 0)),          # eps*I: resident
            ],
            out_specs=pl.BlockSpec((bb, d * d), lambda b: (b, 0)),   # lane-dense
        ),
        compiler_params=pltpu.CompilerParams(
            dimension_semantics=("parallel",),
        ),
        cost_estimate=cost,
    )(xs, w1, b1_2, w2, b2_2, eps_eye)

    return out_flat[:B].reshape(B, d, d)


def ncds_jacobian(x, w1, b1, w2, b2, *, eps=0.01):
    """Single-sample forward matching the PyTorch module: x (d,) -> (d, d)."""
    return ncds_jacobian_batched(x[None, :], w1, b1, w2, b2, eps=eps)[0]


def _xavier_uniform(key, fan_in, fan_out):
    # Matches torch.nn.init.xavier_uniform_ bound = sqrt(6 / (fan_in + fan_out))
    bound = (6.0 / (fan_in + fan_out)) ** 0.5
    return jax.random.uniform(
        key, (fan_in, fan_out), dtype=jnp.float32, minval=-bound, maxval=bound
    )


def _reference(x, w1, b1, w2, b2, eps=0.01):
    d = x.shape[0]
    h = jnp.tanh(x @ w1 + b1)
    J = (h @ w2 + b2).reshape(d, d)
    return -J.T @ J - eps * jnp.eye(d, dtype=jnp.float32)


if __name__ == "__main__":
    d = 16
    hidden_dim_1 = 32
    eps = 0.01
    B = 64  # small demo batch; still yields 2 grid steps (block_b -> 32)

    key = jax.random.PRNGKey(0)
    k_x, k_w1, k_w2 = jax.random.split(key, 3)

    # Deterministic parameter init mirroring the module's init_weights:
    # xavier_uniform for weights, 0.01 for biases.
    w1 = _xavier_uniform(k_w1, d, hidden_dim_1)            # (d, hidden)
    b1 = jnp.full((hidden_dim_1,), 0.01, dtype=jnp.float32)
    w2 = _xavier_uniform(k_w2, hidden_dim_1, d * d)        # (hidden, d*d)
    b2 = jnp.full((d * d,), 0.01, dtype=jnp.float32)

    xs = jax.random.normal(k_x, (B, d), dtype=jnp.float32)

    # Batched kernel.
    out = ncds_jacobian_batched(xs, w1, b1, w2, b2, eps=eps)
    out = jax.block_until_ready(out)

    ref = jax.vmap(lambda x: _reference(x, w1, b1, w2, b2, eps))(xs)
    assert out.shape == (B, d, d)
    assert jnp.allclose(out, ref, atol=1e-4, rtol=1e-4), "batched mismatch vs reference"

    # Single-sample path (exact module-forward semantics).
    out1 = jax.block_until_ready(ncds_jacobian(xs[0], w1, b1, w2, b2, eps=eps))
    assert out1.shape == (d, d)
    assert jnp.allclose(out1, ref[0], atol=1e-4, rtol=1e-4), "single-sample mismatch"

    print("KERNEL_OK")
</pallas_src>

<mosaic_0001>
module attributes {stable_mosaic.version = 11 : i64} {
  func.func @_ncds_jacobian_kernel(%arg0: i32, %arg1: memref<32x16xf32, #tpu.memory_space<vmem>>, %arg2: memref<16x32xf32, #tpu.memory_space<vmem>>, %arg3: memref<1x32xf32, #tpu.memory_space<vmem>>, %arg4: memref<32x256xf32, #tpu.memory_space<vmem>>, %arg5: memref<1x256xf32, #tpu.memory_space<vmem>>, %arg6: memref<1x256xf32, #tpu.memory_space<vmem>>, %arg7: memref<32x256xf32, #tpu.memory_space<vmem>>) attributes {dimension_semantics = [#tpu.dimension_semantics<parallel>], iteration_bounds = array<i64: 2>, scalar_prefetch = 0 : i64, scratch_operands = 0 : i64, tpu.core_type = #tpu.core_type<tc>, window_params = [{transform_indices = @transform_0, window_bounds = array<i64: 32, 16>}, {pipeline_mode = #tpu.pipeline_mode<synchronous>, transform_indices = @transform_1, window_bounds = array<i64: 16, 32>}, {pipeline_mode = #tpu.pipeline_mode<synchronous>, transform_indices = @transform_2, window_bounds = array<i64: 1, 32>}, {pipeline_mode = #tpu.pipeline_mode<synchronous>, transform_indices = @transform_3, window_bounds = array<i64: 32, 256>}, {pipeline_mode = #tpu.pipeline_mode<synchronous>, transform_indices = @transform_4, window_bounds = array<i64: 1, 256>}, {pipeline_mode = #tpu.pipeline_mode<synchronous>, transform_indices = @transform_5, window_bounds = array<i64: 1, 256>}, {transform_indices = @transform_6, window_bounds = array<i64: 32, 256>}]} {
    %c0 = arith.constant 0 : index
    %c0_0 = arith.constant 0 : index
    %0 = vector.load %arg1[%c0, %c0_0] : memref<32x16xf32, #tpu.memory_space<vmem>>, vector<32x16xf32>
    %c0_1 = arith.constant 0 : index
    %c0_2 = arith.constant 0 : index
    %1 = vector.load %arg2[%c0_1, %c0_2] : memref<16x32xf32, #tpu.memory_space<vmem>>, vector<16x32xf32>
    %cst = arith.constant dense<0.000000e+00> : vector<32x32xf32>
    %2 = tpu.matmul %0, %1, %cst {dimension_numbers = #tpu.dot_dimension_numbers<[1], [0], [0], [1], [0, 0, 1, 1], [], []>} : vector<32x16xf32>, vector<16x32xf32>, vector<32x32xf32> -> vector<32x32xf32>
    %c0_3 = arith.constant 0 : index
    %c0_4 = arith.constant 0 : index
    %3 = vector.load %arg3[%c0_3, %c0_4] : memref<1x32xf32, #tpu.memory_space<vmem>>, vector<1x32xf32>
    %4 = vector.broadcast %3 : vector<1x32xf32> to vector<32x32xf32>
    %5 = arith.addf %2, %4 : vector<32x32xf32>
    %6 = math.tanh %5 : vector<32x32xf32>
    %c0_5 = arith.constant 0 : index
    %c0_6 = arith.constant 0 : index
    %7 = vector.load %arg4[%c0_5, %c0_6] : memref<32x256xf32, #tpu.memory_space<vmem>>, vector<32x256xf32>
    %cst_7 = arith.constant dense<0.000000e+00> : vector<32x256xf32>
    %8 = tpu.matmul %6, %7, %cst_7 {dimension_numbers = #tpu.dot_dimension_numbers<[1], [0], [0], [1], [0, 0, 1, 1], [], []>} : vector<32x32xf32>, vector<32x256xf32>, vector<32x256xf32> -> vector<32x256xf32>
    %c0_8 = arith.constant 0 : index
    %c0_9 = arith.constant 0 : index
    %9 = vector.load %arg5[%c0_8, %c0_9] : memref<1x256xf32, #tpu.memory_space<vmem>>, vector<1x256xf32>
    %10 = vector.broadcast %9 : vector<1x256xf32> to vector<32x256xf32>
    %11 = arith.addf %8, %10 : vector<32x256xf32>
    %12 = vector.shape_cast %11 : vector<32x256xf32> to vector<32x16x16xf32>
    %cst_10 = arith.constant dense<0.000000e+00> : vector<32x16x16xf32>
    %13 = tpu.matmul %12, %12, %cst_10 {dimension_numbers = #tpu.dot_dimension_numbers<[1], [1], [2], [2], [0, 0, 0, 2, 1, 2], [0], [0]>} : vector<32x16x16xf32>, vector<32x16x16xf32>, vector<32x16x16xf32> -> vector<32x16x16xf32>
    %14 = vector.shape_cast %13 : vector<32x16x16xf32> to vector<32x256xf32>
    %cst_11 = arith.constant 0.000000e+00 : f32
    %15 = vector.broadcast %cst_11 : f32 to vector<32x256xf32>
    %16 = arith.subf %15, %14 : vector<32x256xf32>
    %c0_12 = arith.constant 0 : index
    %c0_13 = arith.constant 0 : index
    %17 = vector.load %arg6[%c0_12, %c0_13] : memref<1x256xf32, #tpu.memory_space<vmem>>, vector<1x256xf32>
    %18 = vector.broadcast %17 : vector<1x256xf32> to vector<32x256xf32>
    %19 = arith.subf %16, %18 : vector<32x256xf32>
    %c0_14 = arith.constant 0 : index
    %c0_15 = arith.constant 0 : index
    %20 = vector.load %arg7[%c0_14, %c0_15] : memref<32x256xf32, #tpu.memory_space<vmem>>, vector<32x256xf32>
    tpu.vector_store %arg7[%c0_14, %c0_15], %19 {strides = array<i32>} : memref<32x256xf32, #tpu.memory_space<vmem>>, vector<32x256xf32>,
    return
  }
  func.func @transform_0(%arg0: i32) -> (i32, i32) {
    %c0_i32 = arith.constant 0 : i32
    %c0_i32_0 = arith.constant 0 : i32
    return %arg0, %c0_i32 : i32, i32
  }
  func.func @transform_1(%arg0: i32) -> (i32, i32) {
    %c0_i32 = arith.constant 0 : i32
    %c0_i32_0 = arith.constant 0 : i32
    %c0_i32_1 = arith.constant 0 : i32
    return %c0_i32, %c0_i32_0 : i32, i32
  }
  func.func @transform_2(%arg0: i32) -> (i32, i32) {
    %c0_i32 = arith.constant 0 : i32
    %c0_i32_0 = arith.constant 0 : i32
    %c0_i32_1 = arith.constant 0 : i32
    return %c0_i32, %c0_i32_0 : i32, i32
  }
  func.func @transform_3(%arg0: i32) -> (i32, i32) {
    %c0_i32 = arith.constant 0 : i32
    %c0_i32_0 = arith.constant 0 : i32
    %c0_i32_1 = arith.constant 0 : i32
    return %c0_i32, %c0_i32_0 : i32, i32
  }
  func.func @transform_4(%arg0: i32) -> (i32, i32) {
    %c0_i32 = arith.constant 0 : i32
    %c0_i32_0 = arith.constant 0 : i32
    %c0_i32_1 = arith.constant 0 : i32
    return %c0_i32, %c0_i32_0 : i32, i32
  }
  func.func @transform_5(%arg0: i32) -> (i32, i32) {
    %c0_i32 = arith.constant 0 : i32
    %c0_i32_0 = arith.constant 0 : i32
    %c0_i32_1 = arith.constant 0 : i32
    return %c0_i32, %c0_i32_0 : i32, i32
  }
  func.func @transform_6(%arg0: i32) -> (i32, i32) {
    %c0_i32 = arith.constant 0 : i32
    %c0_i32_0 = arith.constant 0 : i32
    return %arg0, %c0_i32 : i32, i32
  }
}

</mosaic_0001>

<bundles_post_ra>
// kernel: tpu_custom_call.1
= control target key start
LH: loop header
LB: loop body
LE: loop exit
PB: predicated region body
PF: predicated region fallthrough
CT: control target
= control target key end

     0   :  { %11 = vsyncpa [#allocation3], 0  ;;  %s9002_s0 = inlined_call_operand.vmem [shape: f32[64,16], index: 0, kind: input, shape index: {}]   ;;  %s9003_s1 = inlined_call_operand.vmem [shape: f32[16,32], index: 1, kind: input, shape index: {}]   ;;  %s9004_s2 = inlined_call_operand.vmem [shape: f32[1,32], index: 2, kind: input, shape index: {}]   ;;  %s9005_s3 = inlined_call_operand.vmem [shape: f32[32,256], index: 3, kind: input, shape index: {}]   ;;  %s9006_s4 = inlined_call_operand.vmem [shape: f32[1,256], index: 4, kind: input, shape index: {}]   ;;  %s9007_s5 = inlined_call_operand.vmem [shape: f32[1,256], index: 5, kind: input, shape index: {}]   ;;  %s9008_s6 = inlined_call_operand.hbm [shape: f32[64,256], index: 6, kind: output, shape index: {}]  }
   0x1   :  { %13 = vsyncpa [#allocation3 + $0x1], 0  ;;  %s7621_s21 = smov 0   ;;  %s7623_s22 = smov 0  }
   0x2   :  { %s7625_s23 = smov 0   ;;  %s7627_s24 = smov 0  }
   0x3 LB: > { %s7642_s25 = sadd.s32 4294967295, %s7572_s24   ;;  %s6856_s26 = sadd.s32 4294967294, %s7572_s24   ;;  %s7572_s24 = sphi %s7627_s24, %s9025_s24   ;;  %s7568_s23 = sphi %s7625_s23, %s9024_s23   ;;  %s7564_s22 = sphi %s7623_s22, %s9023_s22   ;;  %s7560_s21 = sphi %s7621_s21, %s9022_s21  }
   0x4   : > { %s7646_s27 = sadd.s32 1, %s7572_s24   ;;  %s157_s28 = sadd.s32 1, %s7568_s23 }
   0x5   : > { %s154_s29 = ssub.s32 %s7572_s24, %s7646_s27  ;;  %p167_p0 = scmp.ne.s32.totalorder %s7568_s23, %s7564_s22 }
   0x6   : > { %p155_p1 = scmp.eq.s32.totalorder %s154_s29, 0  ;;  %p168_p2 = scmp.eq.s32.totalorder %s7642_s25, 1 }
   0x7   : > { %p173_p3 = scmp.ne.s32.totalorder %s7564_s22, %s7560_s21  ;;  %p174_p4 = scmp.eq.s32.totalorder %s6856_s26, 1 }
   0x8   : > { %s7657_s30 = scalar_select %p155_p1, %s7568_s23, %s157_s28  }
   0x9   : > { %p7659_p5 = por %p168_p2, %p167_p0  ;;  %p7663_p6 = por %p174_p4, %p173_p3 }
   0xa   : > { %p6859_p7 = scmp.ge.s32.totalorder %s7572_s24, 1  ;;  %p216_p8 = scmp.lt.s32.totalorder %s7572_s24, 3 }
   0xc   : > { %p217_p9 = pnand %p6859_p7, %p216_p8 }
   0xe   : > { %220 = sbr.rel (%p217_p9) target bundleno = 1265 (0x4f1), region = 44 }
  0x15   : > { %v257_v0 = vld [vmem:[%s9003_s1] sm:$0xff]  ;;  %v258_v1 = vld [vmem:[%s9003_s1 + $0x8] sm:$0xff]  ;;  %s6861_s13 = sshll.u32 %s7642_s25, 2  ;;  %vm266_vm0 = vcmask 130048   ;;  %v371_v8 = vld [vmem:[%s9005_s3 + $0x18] sm:$0xff]  ;;  %v7574_v14 = vmov 0.0   ;;  %v378_v33 = vlaneseq }
  0x16   : > { %v7312_v2 = vpack.c.bf16 %v258_v1, %v257_v0  ;;  %p247_p10 = scmp.lt.s32.totalorder %s6861_s13, 7  ;;  %v369_v7 = vld [vmem:[%s9005_s3 + $0x8] sm:$0xff]  ;;  %v368_v9 = vld [vmem:[%s9005_s3] sm:$0xff]  ;;  %v370_v11 = vld [vmem:[%s9005_s3 + $0x10] sm:$0xff]  ;;  %465 = vmatprep.mubr.f32.mxu1 %v7574_v14  ;;  %vm388_vm1 = vcmask 261120   ;;  %s7575_s29 = smov 80  }
  0x17   : > { %v7316_v10 = vpack.c.bf16 %v371_v8, %v369_v7  ;;  %v373_v12 = vld [vmem:[%s9005_s3 + $0x28] sm:$0xff]  ;;  %v375_v13 = vld [vmem:[%s9005_s3 + $0x38] sm:$0xff]  ;;  %v7318_v15 = vpack.c.bf16 %v370_v11, %v368_v9  ;;  %v372_v17 = vld [vmem:[%s9005_s3 + $0x20] sm:$0xff]  ;;  %v7714_v34 = vshrl.u32 %v378_v33, 7  ;;  %s7576_s9 = smov 112   ;;  %s7577_s10 = smov 64  }
  0x18   : > { %7313 = vmatprep.subr.bf16.mxu0 %v7312_v2  ;;  %s9027_s13 = smov (!%p247_p10, %s6861_s13), 7  ;;  %v7320_v16 = vpack.c.bf16 %v375_v13, %v373_v12  ;;  %v374_v18 = vld [vmem:[%s9005_s3 + $0x30] sm:$0xff]  ;;  %v6863_v20 = vld [vmem:[%s9004_s2] ss:$0 sm:$0xff]  ;;  %s7578_s11 = smov 96   ;;  %vm6690_vm2 = vcmask 392192  }
  0x19   : > { %7315 = vmatpush3.bf16.msra.mxu0 %v7312_v2  ;;  %s6862_s14 = sshll.u32 %s9027_s13, 3  ;;  %7317 = vmatprep.subr.bf16.mxu1 %v7316_v10  ;;  %v7322_v19 = vpack.c.bf16 %v374_v18, %v372_v17  ;;  %9016 = vst [vmem:[#allocation5_spill] sm:$0xff] %v7714_v34  ;;  %v9009_v35 = vsub.s32 0, %v7714_v34  ;;  %v376_v36 = vld [vmem:[%s9006_s4] sm:$0x3]  ;;  %v9010_v42 = vsub.s32 1, %v7714_v34 }
  0x1a   : > { %s250_s17 = scalar_lea.vmem %s9002_s0, %s6862_s14  ;;  %7319 = vmatpush1.bf16.msra.mxu1 %v7318_v15  ;;  %s7579_s12 = smov 32   ;;  %v7582_v58 = vmov 1983009808   ;;  %v7583_v1 = vmov 1934713408   ;;  %vm6695_vm3 = vcmask 523264  }
  0x1b   : > { %v253_v3 = vld [vmem:[%s250_s17] sm:$0xff]  ;;  %v254_v4 = vld [vmem:[%s250_s17 + $0x8] sm:$0xff]  ;;  %v255_v5 = vld [vmem:[%s250_s17 + $0x10] sm:$0xff]  ;;  %7321 = vmatprep.subr.bf16.mxu1 %v7320_v16  ;;  %v381_v37 = vrot.slane %v376_v36, %v9009_v35  ;;  %v385_v45 = vrot.slane %v376_v36, %v9010_v42  ;;  %s7580_s13 = smov 48   ;;  %s7581_s14 = smov 16   ;;  %v669_v59 = vunpack.c.l.s4 %v7582_v58  ;;  %v733_v2 = vunpack.c.l.s4 %v7583_v1 }
  0x1c   : > { %7082 = vmatprep.mubr.msk.f32.mxu0 %vm266_vm0, %v253_v3  ;;  %v256_v6 = vld [vmem:[%s250_s17 + $0x18] sm:$0xff]  ;;  %vm6700_vm4 = vcmask 654336   ;;  %vm6705_vm5 = vcmask 785408   ;;  %s243_s17 = sand.u32 1, %s7564_s22   ;;  %vm6710_vm6 = vcmask 916480   ;;  %s6943_s20 = sshll.u32 %s7642_s25, 10 }
  0x1d   : > { %7083 = vmatmul.mubr.msk.f32.vlgmr.msra.gmra.mrb[0].mxu0 %vm266_vm0, %v254_v4  ;;  %v670_v62 = vunpack.c.0.s8 %v669_v59  ;;  %v734_v9 = vunpack.c.0.s8 %v733_v2  ;;  %s6860_s18 = sshll.u32 %s243_s17, 6  ;;  %s8960_s25 = scalar_lea.sflag [#allocation3], %s243_s17 }
  0x1e   : > { %7085 = vmatprep.mubr.msk.f32.mxu0 %vm266_vm0, %v255_v5  ;;  %7323 = vmatpush1.bf16.msra.mxu1 %v7322_v19  ;;  %s8858_s19 = scalar_lea.vmem [#allocation2], %s6860_s18 }
  0x1f   : > { %v7855_v4 = vsub.s32 %v670_v62, %v7714_v34  ;;  %s6794_s26 = sshll.u32 %s8858_s19, 4  ;;  %s8955_s26 = int_to_ptr.vmem [resolvable:$true] %s6794_s26 }
  0x21   : > { %7086 = vmatmul.mubr.msk.f32.gmra.mrb[2].mxu0 %vm266_vm0, %v256_v6 }
  0xf0   : > { %v7084_v21 = vpop.f32.mrb[0].mxu0 }
  0xf1   : > { %v345_v22 = vpop.f32.mrb[1].mxu0  ;;  %v351_v24 = vadd.f32 %v7084_v21, %v6863_v20 }
  0xf2   : > { %v346_v23 = vadd.f32 %v6863_v20, %v345_v22 }
  0xf4   : > { %7502 = vtanh.f32 %v346_v23  ;;  %v7087_v25 = vpop.f32.mrb[2].mxu0 }
  0xf5   : > { %v355_v26 = vpop.f32.mrb[3].mxu0  ;;  %7504 = vtanh.f32 %v351_v24  ;;  %v361_v28 = vadd.f32 %v7087_v25, %v6863_v20 }
  0xf6   : > { %v356_v27 = vadd.f32 %v6863_v20, %v355_v26  ;;  %v7865_v20 = vsub.s32 %v734_v9, %v7714_v34 }
  0xf8   : > { %7506 = vtanh.f32 %v356_v27 }
  0xf9   : > { %7508 = vtanh.f32 %v361_v28 }
  0xfe   : > { %v7503_v29 = vpop.eup %7502 }
  0xff   : > { %6868 = vmatmul.mubr.msk.f32.vlgmr.msra.gmra.mrb[0].mxu1 %vm388_vm1, %v7503_v29  ;;  %v7505_v30 = vpop.eup %7504 }
 0x100   : > { %471 = vmatprep.mubr.f32.mxu1 %v7574_v14 }
 0x102   : > { %v7507_v31 = vpop.eup %7506 }
 0x103   : > { %6869 = vmatmul.mubr.msk.f32.gmra.mrb[2].mxu1 %vm388_vm1, %v7505_v30  ;;  %v7509_v32 = vpop.eup %7508 }
 0x104   : > { %477 = vmatprep.mubr.f32.mxu1 %v7574_v14 }
 0x107   : > { %6870 = vmatmul.mubr.msk.f32.gmra.mrb[4].mxu1 %vm388_vm1, %v7507_v31 }
 0x108   : > { %483 = vmatprep.mubr.f32.mxu1 %v7574_v14 }
 0x10b   : > { %6871 = vmatmul.mubr.msk.f32.gmra.mrb[6].mxu1 %vm388_vm1, %v7509_v32 }
 0x1d2   : > { %v467_v38 = vpop.f32.mrb[0].mxu1 }
 0x1d3   : > { %v7722_v39 = vadd.f32 %v467_v38, %v381_v37  ;;  %v469_v40 = vpop.f32.mrb[1].mxu1 }
 0x1d4   : > { %v7739_v48 = vadd.f32 %v469_v40, %v385_v45 }
 0x1d5   : > { %518 = vrot.lane.b32.xlu1 %v7722_v39, %s7575_s29  ;;  %494 = vrot.lane.b32.xlu0 %v7722_v39, %s7576_s9 }
 0x1d6   : > { %v473_v41 = vpop.f32.mrb[2].mxu1 }
 0x1d7   : > { %v475_v43 = vpop.f32.mrb[3].mxu1  ;;  %v7761_v52 = vadd.f32 %v473_v41, %v381_v37 }
 0x1d8   : > { %v7775_v53 = vadd.f32 %v475_v43, %v385_v45 }
 0x1d9   : > { %530 = vrot.lane.b32.xlu1 %v7722_v39, %s7577_s10  ;;  %506 = vrot.lane.b32.xlu0 %v7722_v39, %s7578_s11 }
 0x1da   : > { %v479_v44 = vpop.f32.mrb[4].mxu1 }
 0x1db   : > { %v481_v46 = vpop.f32.mrb[5].mxu1  ;;  %v7793_v54 = vadd.f32 %v479_v44, %v381_v37 }
 0x1dc   : > { %v7807_v55 = vadd.f32 %v481_v46, %v385_v45 }
 0x1dd   : > { %554 = vrot.lane.b32.xlu1 %v7722_v39, %s7579_s12  ;;  %542 = vrot.lane.b32.xlu0 %v7722_v39, %s7580_s13 }
 0x1de   : > { %v485_v47 = vpop.f32.mrb[6].mxu1 }
 0x1df   : > { %v7741_v49 = vadd.f32 %v485_v47, %v381_v37  ;;  %v487_v50 = vpop.f32.mrb[7].mxu1 }
 0x1e0   : > { %v7743_v51 = vadd.f32 %v487_v50, %v385_v45 }
 0x1e1   : > { %582 = vrot.lane.b32.xlu1 %v7739_v48, %s7576_s9  ;;  %566 = vrot.lane.b32.xlu0 %v7722_v39, %s7581_s14 }
 0x1e5   : > { %606 = vrot.lane.b32.xlu1 %v7739_v48, %s7575_s29  ;;  %594 = vrot.lane.b32.xlu0 %v7739_v48, %s7578_s11 }
 0x1e9   : > { %630 = vrot.lane.b32.xlu1 %v7739_v48, %s7580_s13  ;;  %618 = vrot.lane.b32.xlu0 %v7739_v48, %s7577_s10 }
 0x1ed   : > { %654 = vrot.lane.b32.xlu1 %v7739_v48, %s7581_s14  ;;  %642 = vrot.lane.b32.xlu0 %v7739_v48, %s7579_s12 }
 0x1f1   : > { %508 = vrot.lane.b32.xlu1 %v7761_v52, %s7578_s11  ;;  %496 = vrot.lane.b32.xlu0 %v7761_v52, %s7576_s9 }
 0x1f5   : > { %532 = vrot.lane.b32.xlu1 %v7761_v52, %s7577_s10  ;;  %520 = vrot.lane.b32.xlu0 %v7761_v52, %s7575_s29 }
 0x1f9   : > { %556 = vrot.lane.b32.xlu1 %v7761_v52, %s7579_s12  ;;  %544 = vrot.lane.b32.xlu0 %v7761_v52, %s7580_s13 }
 0x1fd   : > { %584 = vrot.lane.b32.xlu1 %v7775_v53, %s7576_s9  ;;  %568 = vrot.lane.b32.xlu0 %v7761_v52, %s7581_s14 }
 0x201   : > { %608 = vrot.lane.b32.xlu1 %v7775_v53, %s7575_s29  ;;  %596 = vrot.lane.b32.xlu0 %v7775_v53, %s7578_s11 }
 0x205   : > { %632 = vrot.lane.b32.xlu1 %v7775_v53, %s7580_s13  ;;  %620 = vrot.lane.b32.xlu0 %v7775_v53, %s7577_s10 }
 0x209   : > { %656 = vrot.lane.b32.xlu1 %v7775_v53, %s7581_s14  ;;  %644 = vrot.lane.b32.xlu0 %v7775_v53, %s7579_s12 }
 0x20d   : > { %510 = vrot.lane.b32.xlu1 %v7793_v54, %s7578_s11  ;;  %498 = vrot.lane.b32.xlu0 %v7793_v54, %s7576_s9 }
 0x211   : > { %534 = vrot.lane.b32.xlu1 %v7793_v54, %s7577_s10  ;;  %522 = vrot.lane.b32.xlu0 %v7793_v54, %s7575_s29 }
 0x215   : > { %558 = vrot.lane.b32.xlu1 %v7793_v54, %s7579_s12  ;;  %546 = vrot.lane.b32.xlu0 %v7793_v54, %s7580_s13 }
 0x219   : > { %586 = vrot.lane.b32.xlu1 %v7807_v55, %s7576_s9  ;;  %570 = vrot.lane.b32.xlu0 %v7793_v54, %s7581_s14 }
 0x21d   : > { %610 = vrot.lane.b32.xlu1 %v7807_v55, %s7575_s29  ;;  %598 = vrot.lane.b32.xlu0 %v7807_v55, %s7578_s11 }
 0x221   : > { %634 = vrot.lane.b32.xlu1 %v7807_v55, %s7580_s13  ;;  %622 = vrot.lane.b32.xlu0 %v7807_v55, %s7577_s10 }
 0x225   : > { %658 = vrot.lane.b32.xlu1 %v7807_v55, %s7581_s14  ;;  %646 = vrot.lane.b32.xlu0 %v7807_v55, %s7579_s12 }
 0x229   : > { %512 = vrot.lane.b32.xlu1 %v7741_v49, %s7578_s11  ;;  %500 = vrot.lane.b32.xlu0 %v7741_v49, %s7576_s9 }
 0x22d   : > { %536 = vrot.lane.b32.xlu1 %v7741_v49, %s7577_s10  ;;  %524 = vrot.lane.b32.xlu0 %v7741_v49, %s7575_s29 }
 0x231   : > { %560 = vrot.lane.b32.xlu1 %v7741_v49, %s7579_s12  ;;  %548 = vrot.lane.b32.xlu0 %v7741_v49, %s7580_s13 }
 0x235   : > { %588 = vrot.lane.b32.xlu1 %v7743_v51, %s7576_s9  ;;  %572 = vrot.lane.b32.xlu0 %v7741_v49, %s7581_s14 }
 0x239   : > { %612 = vrot.lane.b32.xlu1 %v7743_v51, %s7575_s29  ;;  %600 = vrot.lane.b32.xlu0 %v7743_v51, %s7578_s11 }
 0x23d   : > { %636 = vrot.lane.b32.xlu1 %v7743_v51, %s7580_s13  ;;  %624 = vrot.lane.b32.xlu0 %v7743_v51, %s7577_s10 }
 0x241   : > { %660 = vrot.lane.b32.xlu1 %v7743_v51, %s7581_s14  ;;  %648 = vrot.lane.b32.xlu0 %v7743_v51, %s7579_s12 }
 0x247   : > { %v519_v56 = vpop.permute.xlu1 %518  ;;  %v495_v57 = vpop.permute.xlu0 %494 }
 0x248   : > { %v682_v5 = vcombine.low %v495_v57, %v519_v56  ;;  %v683_v21 = vcombine.high %v495_v57, %v519_v56 }
 0x24a   : > { %v690_v13 = vrot.slane %v682_v5, %v7855_v4  ;;  %v697_v36 = vrot.slane %v683_v21, %v7855_v4 }
 0x24b   : > { %v531_v60 = vpop.permute.xlu1 %530  ;;  %v507_v61 = vpop.permute.xlu0 %506 }
 0x24c   : > { %v666_v3 = vcombine.low %v7722_v39, %v507_v61  ;;  %v667_v14 = vcombine.high %v7722_v39, %v507_v61 }
 0x24e   : > { %v7858_v10 = vrot.slane %v666_v3, %v7855_v4  ;;  %v681_v27 = vrot.slane %v667_v14, %v7855_v4 }
 0x24f   : > { %v555_v63 = vpop.permute.xlu1 %554  ;;  %v543_v0 = vpop.permute.xlu0 %542 }
 0x250   : > { %v698_v6 = vcombine.low %v531_v60, %v555_v63  ;;  %v699_v16 = vcombine.high %v531_v60, %v555_v63  ;;  %v730_v22 = vcombine.low %v7858_v10, %v690_v13  ;;  %v746_v41 = vcombine.low %v681_v27, %v697_v36 }
 0x251   : > { %v747_v44 = vcombine.high %v681_v27, %v697_v36  ;;  %v731_v63 = vcombine.high %v7858_v10, %v690_v13 }
 0x252   : > { %v706_v17 = vrot.slane %v698_v6, %v7855_v4  ;;  %v713_v28 = vrot.slane %v699_v16, %v7855_v4  ;;  %v738_v37 = vrot.slane %v730_v22, %v7865_v20 }
 0x253   : > { %v583_v7 = vpop.permute.xlu1 %582  ;;  %v567_v8 = vpop.permute.xlu0 %566  ;;  %v761_v16 = vrot.slane %v747_v44, %v7865_v20 }
 0x254   : > { %v714_v11 = vcombine.low %v543_v0, %v567_v8  ;;  %v715_v12 = vcombine.high %v543_v0, %v567_v8 }
 0x256   : > { %v722_v15 = vrot.slane %v714_v11, %v7855_v4  ;;  %v729_v23 = vrot.slane %v715_v12, %v7855_v4 }
 0x257   : > { %v607_v18 = vpop.permute.xlu1 %606  ;;  %v595_v19 = vpop.permute.xlu0 %594 }
 0x258   : > { %v818_v24 = vcombine.low %v583_v7, %v607_v18  ;;  %v802_v25 = vcombine.low %v7739_v48, %v595_v19  ;;  %v762_v26 = vcombine.low %v706_v17, %v722_v15  ;;  %v819_v29 = vcombine.high %v583_v7, %v607_v18 }
 0x259   : > { %v803_v30 = vcombine.high %v7739_v48, %v595_v19  ;;  %v778_v38 = vcombine.low %v713_v28, %v729_v23  ;;  %v763_v50 = vcombine.high %v706_v17, %v722_v15  ;;  %v779_v60 = vcombine.high %v713_v28, %v729_v23 }
 0x25a   : > { %v770_v33 = vrot.slane %v762_v26, %v7865_v20  ;;  %v826_v39 = vrot.slane %v818_v24, %v7855_v4  ;;  %v810_v40 = vrot.slane %v802_v25, %v7855_v4  ;;  %v833_v45 = vrot.slane %v819_v29, %v7855_v4 }
 0x25b   : > { %v631_v31 = vpop.permute.xlu1 %630  ;;  %v619_v32 = vpop.permute.xlu0 %618  ;;  %v817_v46 = vrot.slane %v803_v30, %v7855_v4  ;;  %v786_v61 = vrot.slane %v778_v38, %v7865_v20  ;;  %v777_v11 = vrot.slane %v763_v50, %v7865_v20  ;;  %v754_v15 = vrot.slane %v746_v41, %v7865_v20 }
 0x25c   : > { %v794_v43 = vcombine.low %v738_v37, %v770_v33  ;;  %v866_v62 = vcombine.low %v810_v40, %v826_v39  ;;  %v867_v5 = vcombine.high %v810_v40, %v826_v39  ;;  %v745_v18 = vrot.slane %v731_v63, %v7865_v20 }
 0x25d   : > { %v882_v6 = vcombine.low %v817_v46, %v833_v45  ;;  %v883_v7 = vcombine.high %v817_v46, %v833_v45  ;;  %v793_v24 = vrot.slane %v779_v60, %v7865_v20  ;;  %v795_v30 = vcombine.high %v738_v37, %v770_v33 }
 0x25e   : > { %v874_v17 = vrot.slane %v866_v62, %v7865_v20  ;;  %v881_v29 = vrot.slane %v867_v5, %v7865_v20  ;;  %v796_v36 = vcombine.low %v745_v18, %v777_v11  ;;  %v797_v45 = vcombine.high %v745_v18, %v777_v11 }
 0x25f   : > { %v655_v47 = vpop.permute.xlu1 %654  ;;  %v643_v48 = vpop.permute.xlu0 %642  ;;  %1754 = vxpose.xlu0.b32.start [1/2] (short) (narrow) %v794_v43, 16  ;;  %v890_v27 = vrot.slane %v882_v6, %v7865_v20  ;;  %v897_v28 = vrot.slane %v883_v7, %v7865_v20 }
 0x260   : > { %v850_v56 = vcombine.low %v631_v31, %v655_v47  ;;  %v851_v57 = vcombine.high %v631_v31, %v655_v47  ;;  %v834_v58 = vcombine.low %v619_v32, %v643_v48  ;;  %v835_v59 = vcombine.high %v619_v32, %v643_v48 }
 0x261   : > { %v798_v32 = vcombine.low %v754_v15, %v786_v61 }
 0x262   : > { %v858_v0 = vrot.slane %v850_v56, %v7855_v4  ;;  %v865_v1 = vrot.slane %v851_v57, %v7855_v4  ;;  %v842_v2 = vrot.slane %v834_v58, %v7855_v4  ;;  %v849_v3 = vrot.slane %v835_v59, %v7855_v4 }
 0x263   : > { %v7886_v8 = vpop.permute.xlu1 %508  ;;  %v7888_v9 = vpop.permute.xlu0 %496  ;;  %v7909_v56 = vcombine.low %v761_v16, %v793_v24  ;;  %v7916_v57 = vcombine.high %v754_v15, %v786_v61  ;;  %v7920_v59 = vcombine.high %v761_v16, %v793_v24 }
 0x264   : > { %v898_v12 = vcombine.low %v842_v2, %v858_v0  ;;  %v899_v14 = vcombine.high %v842_v2, %v858_v0  ;;  %v914_v10 = vcombine.low %v849_v3, %v865_v1  ;;  %v915_v13 = vcombine.high %v849_v3, %v865_v1 }
 0x265   : > { %v938_v5 = vcombine.low %v7761_v52, %v7886_v8  ;;  %v939_v6 = vcombine.high %v7761_v52, %v7886_v8 }
 0x266   : > { %v906_v19 = vrot.slane %v898_v12, %v7865_v20  ;;  %v922_v21 = vrot.slane %v914_v10, %v7865_v20  ;;  %v929_v22 = vrot.slane %v915_v13, %v7865_v20  ;;  %v913_v23 = vrot.slane %v899_v14, %v7865_v20 }
 0x267   : > { %v7900_v25 = vpop.permute.xlu1 %532  ;;  %v521_v26 = vpop.permute.xlu0 %520  ;;  %v946_v15 = vrot.slane %v938_v5, %v7855_v4  ;;  %v953_v16 = vrot.slane %v939_v6, %v7855_v4 }
 0x268   : > { %v930_v31 = vcombine.low %v874_v17, %v906_v19  ;;  %v934_v38 = vcombine.low %v890_v27, %v922_v21  ;;  %v7905_v39 = vcombine.low %v897_v28, %v929_v22  ;;  %v932_v40 = vcombine.low %v881_v29, %v913_v23 }
 0x269   : > { %v7907_v41 = vcombine.high %v881_v29, %v913_v23  ;;  %v931_v44 = vcombine.high %v874_v17, %v906_v19  ;;  %v7918_v58 = vcombine.high %v890_v27, %v922_v21  ;;  %v954_v60 = vcombine.low %v7888_v9, %v521_v26 }
 0x26a   : > { %1867 = vxpose.xlu1.b32.start [1/2] (short) (narrow) %v795_v30, 16  ;;  %1755 = vxpose.xlu0.b32.end [2/2] (short) (narrow) %v930_v31, 16  ;;  %v7324_v48 = vpack.c.bf16 %v930_v31, %v794_v43  ;;  %v7340_v50 = vpack.c.bf16 %v934_v38, %v798_v32  ;;  %v7911_v33 = vpack.c.bf16 %v932_v40, %v796_v36 }
 0x26b   : > { %v557_v46 = vpop.permute.xlu1 %556  ;;  %v545_v47 = vpop.permute.xlu0 %544  ;;  %v7914_v37 = vpack.c.bf16 %v7907_v41, %v797_v45  ;;  %v7925_v43 = vpack.c.bf16 %v7905_v39, %v7909_v56  ;;  %v7927_v62 = vcombine.high %v897_v28, %v929_v22  ;;  %v955_v63 = vcombine.high %v7888_v9, %v521_v26 }
 0x26c   : > { %7325 = vmatprep.subr.bf16.mxu0 %v7324_v48  ;;  %7341 = vmatprep.subr.bf16.mxu1 %v7340_v50  ;;  %v7930_v0 = vpack.c.bf16 %v931_v44, %v795_v30  ;;  %v7934_v61 = vpack.c.bf16 %v7918_v58, %v7916_v57  ;;  %v962_v9 = vrot.slane %v954_v60, %v7855_v4 }
 0x26d   : > { %7327 = vmatpush3.bf16.msra.mxu0 %v7324_v48  ;;  %7343 = vmatpush3.bf16.msra.mxu1 %v7340_v50  ;;  %v7939_v3 = vpack.c.bf16 %v7927_v62, %v7920_v59  ;;  %v969_v11 = vrot.slane %v955_v63, %v7855_v4  ;;  %v970_v12 = vcombine.low %v7900_v25, %v557_v46 }
 0x26e   : > { %7349 = vmatprep.subr.bf16.mxu1 %v7925_v43  ;;  %1868 = vxpose.xlu1.b32.end [2/2] (short) (narrow) %v931_v44, 16  ;;  %v971_v52 = vcombine.high %v7900_v25, %v557_v46  ;;  %v1002_v19 = vcombine.low %v946_v15, %v962_v9  ;;  %v1003_v21 = vcombine.high %v946_v15, %v962_v9 }
 0x26f   : > { %v585_v1 = vpop.permute.xlu1 %584  ;;  %v569_v2 = vpop.permute.xlu0 %568  ;;  %1980 = vxpose.xlu0.b32.start [1/2] (short) (narrow) %v796_v36, 16  ;;  %7329 = vmatprep.subr.bf16.mxu0 %v7930_v0  ;;  %v1018_v22 = vcombine.low %v953_v16, %v969_v11  ;;  %v1019_v23 = vcombine.high %v953_v16, %v969_v11  ;;  %v978_v24 = vrot.slane %v970_v12, %v7855_v4 }
 0x270   : > { %v986_v7 = vcombine.low %v545_v47, %v569_v2  ;;  %v987_v14 = vcombine.high %v545_v47, %v569_v2  ;;  %v985_v30 = vrot.slane %v971_v52, %v7855_v4  ;;  %v1010_v44 = vrot.slane %v1002_v19, %v7865_v20 }
 0x271   : > { %v1017_v46 = vrot.slane %v1003_v21, %v7865_v20  ;;  %v7963_v47 = vrot.slane %v1018_v22, %v7865_v20 }
 0x272   : > { %2206 = vxpose.xlu1.b32.start [1/2] (short) (narrow) %v798_v32, 16  ;;  %v994_v8 = vrot.slane %v986_v7, %v7855_v4  ;;  %v1001_v26 = vrot.slane %v987_v14, %v7855_v4 }
 0x273   : > { %v609_v10 = vpop.permute.xlu1 %608  ;;  %v597_v13 = vpop.permute.xlu0 %596  ;;  %1981 = vxpose.xlu0.b32.end [2/2] (short) (narrow) %v932_v40, 16 }
 0x274   : > { %v1090_v17 = vcombine.low %v585_v1, %v609_v10  ;;  %v1074_v18 = vcombine.low %v7775_v53, %v597_v13  ;;  %v1091_v27 = vcombine.high %v585_v1, %v609_v10  ;;  %v1075_v28 = vcombine.high %v7775_v53, %v597_v13 }
 0x275   : > { %v1034_v36 = vcombine.low %v978_v24, %v994_v8  ;;  %v1035_v40 = vcombine.high %v978_v24, %v994_v8  ;;  %v7966_v53 = vrot.slane %v1019_v23, %v7865_v20  ;;  %v1050_v60 = vcombine.low %v985_v30, %v1001_v26 }
 0x276   : > { %2207 = vxpose.xlu1.b32.end [2/2] (short) (narrow) %v934_v38, 16  ;;  %v1098_v31 = vrot.slane %v1090_v17, %v7855_v4  ;;  %v1082_v32 = vrot.slane %v1074_v18, %v7855_v4  ;;  %v1105_v38 = vrot.slane %v1091_v27, %v7855_v4  ;;  %v1051_v63 = vcombine.high %v985_v30, %v1001_v26 }
 0x277   : > { %v633_v29 = vpop.permute.xlu1 %632  ;;  %v621_v25 = vpop.permute.xlu0 %620  ;;  %2093 = vxpose.xlu0.b32.start [1/2] (short) (narrow) %v797_v45, 16  ;;  %v1089_v45 = vrot.slane %v1075_v28, %v7855_v4  ;;  %v1042_v11 = vrot.slane %v1034_v36, %v7865_v20  ;;  %v1049_v12 = vrot.slane %v1035_v40, %v7865_v20  ;;  %v1058_v8 = vrot.slane %v1050_v60, %v7865_v20 }
 0x278   : > { %v1138_v7 = vcombine.low %v1082_v32, %v1098_v31  ;;  %v1139_v9 = vcombine.high %v1082_v32, %v1098_v31  ;;  %v1065_v17 = vrot.slane %v1051_v63, %v7865_v20 }
 0x279   : > { %v1154_v15 = vcombine.low %v1089_v45, %v1105_v38  ;;  %v1066_v23 = vcombine.low %v1010_v44, %v1042_v11  ;;  %v1068_v26 = vcombine.low %v1017_v46, %v1049_v12  ;;  %v1067_v32 = vcombine.high %v1010_v44, %v1042_v11 }
 0x27a   : > { %2432 = vxpose.xlu1.b32.start [1/2] (short) (narrow) %v7909_v56, 16  ;;  %v1146_v24 = vrot.slane %v1138_v7, %v7865_v20  ;;  %v1153_v27 = vrot.slane %v1139_v9, %v7865_v20 }
 0x27b   : > { %v657_v48 = vpop.permute.xlu1 %656  ;;  %v645_v50 = vpop.permute.xlu0 %644  ;;  %2094 = vxpose.xlu0.b32.end [2/2] (short) (narrow) %v7907_v41, 16  ;;  %v1155_v41 = vcombine.high %v1089_v45, %v1105_v38  ;;  %v1162_v36 = vrot.slane %v1154_v15, %v7865_v20 }
 0x27c   : > { %v1122_v1 = vcombine.low %v633_v29, %v657_v48  ;;  %v1123_v2 = vcombine.high %v633_v29, %v657_v48  ;;  %v1106_v5 = vcombine.low %v621_v25, %v645_v50  ;;  %v1107_v6 = vcombine.high %v621_v25, %v645_v50 }
 0x27d   : > { %v1169_v40 = vrot.slane %v1155_v41, %v7865_v20  ;;  %v7996_v48 = vcombine.high %v1017_v46, %v1049_v12  ;;  %v7999_v50 = vcombine.low %v7966_v53, %v1065_v17  ;;  %v8026_v12 = vcombine.high %v7963_v47, %v1058_v8 }
 0x27e   : > { %v1130_v14 = vrot.slane %v1122_v1, %v7855_v4  ;;  %v1137_v56 = vrot.slane %v1123_v2, %v7855_v4  ;;  %v1114_v10 = vrot.slane %v1106_v5, %v7855_v4  ;;  %v1121_v13 = vrot.slane %v1107_v6, %v7855_v4  ;;  %2433 = vxpose.xlu1.b32.end [2/2] (short) (narrow) %v7905_v39, 16 }
 0x27f   : > { %v7979_v16 = vpop.permute.xlu1 %510  ;;  %v499_v52 = vpop.permute.xlu0 %498  ;;  %2319 = vxpose.xlu0.b32.start [1/2] (short) (narrow) %v7916_v57, 16  ;;  %v1070_v57 = vcombine.low %v7963_v47, %v1058_v8 }
 0x280   : > { %v1170_v18 = vcombine.low %v1114_v10, %v1130_v14  ;;  %v1171_v19 = vcombine.high %v1114_v10, %v1130_v14  ;;  %v1186_v21 = vcombine.low %v1121_v13, %v1137_v56  ;;  %v1187_v22 = vcombine.high %v1121_v13, %v1137_v56 }
 0x281   : > { %v8031_v56 = vcombine.high %v7966_v53, %v1065_v17  ;;  %v1210_v47 = vcombine.low %v7793_v54, %v7979_v16  ;;  %v1211_v53 = vcombine.high %v7793_v54, %v7979_v16 }
 0x282   : > { %v1178_v39 = vrot.slane %v1170_v18, %v7865_v20  ;;  %v1185_v28 = vrot.slane %v1171_v19, %v7865_v20  ;;  %v1194_v29 = vrot.slane %v1186_v21, %v7865_v20  ;;  %v1201_v25 = vrot.slane %v1187_v22, %v7865_v20  ;;  %2658 = vxpose.xlu1.b32.start [1/2] (short) (narrow) %v1066_v23, 16 }
 0x283   : > { %v7990_v30 = vpop.permute.xlu1 %534  ;;  %v523_v31 = vpop.permute.xlu0 %522  ;;  %2320 = vxpose.xlu0.b32.end [2/2] (short) (narrow) %v7918_v58, 16 }
 0x284   : > { %v1202_v38 = vcombine.low %v1146_v24, %v1178_v39  ;;  %v1204_v45 = vcombine.low %v1153_v27, %v1185_v28  ;;  %v1203_v60 = vcombine.high %v1146_v24, %v1178_v39  ;;  %v8001_v63 = vcombine.low %v1162_v36, %v1194_v29 }
 0x285   : > { %v8003_v1 = vcombine.high %v1153_v27, %v1185_v28  ;;  %v8005_v44 = vcombine.low %v1169_v40, %v1201_v25  ;;  %v8028_v14 = vcombine.high %v1162_v36, %v1194_v29  ;;  %v8033_v10 = vcombine.high %v1169_v40, %v1201_v25 }
 0x286   : > { %v8007_v2 = vpack.c.bf16 %v1202_v38, %v1066_v23  ;;  %v8009_v5 = vpack.c.bf16 %v1204_v45, %v1068_v26  ;;  %2659 = vxpose.xlu1.b32.end [2/2] (short) (narrow) %v1202_v38, 16  ;;  %v8011_v7 = vpack.c.bf16 %v1203_v60, %v1067_v32  ;;  %v8014_v46 = vpack.c.bf16 %v8001_v63, %v1070_v57 }
 0x287   : > { %v559_v58 = vpop.permute.xlu1 %558  ;;  %v547_v6 = vpop.permute.xlu0 %546  ;;  %v8018_v9 = vpack.c.bf16 %v8003_v1, %v7996_v48  ;;  %v8022_v11 = vpack.c.bf16 %v8005_v44, %v7999_v50  ;;  %2545 = vxpose.xlu0.b32.start [1/2] (short) (narrow) %v7920_v59, 16  ;;  %v1226_v13 = vcombine.low %v499_v52, %v523_v31  ;;  %v1227_v15 = vcombine.high %v499_v52, %v523_v31 }
 0x288   : > { %v8037_v41 = vpack.c.bf16 %v8028_v14, %v8026_v12  ;;  %v8041_v59 = vpack.c.bf16 %v8033_v10, %v8031_v56  ;;  %v1242_v21 = vcombine.low %v7990_v30, %v559_v58  ;;  %v1225_v27 = vrot.slane %v1211_v53, %v7855_v4 }
 0x289   : > { %v1234_v8 = vrot.slane %v1226_v13, %v7855_v4  ;;  %v8050_v17 = vrot.slane %v1227_v15, %v7855_v4  ;;  %v1243_v54 = vcombine.high %v7990_v30, %v559_v58 }
 0x28a   : > { %2884 = vxpose.xlu1.b32.start [1/2] (short) (narrow) %v1068_v26, 16  ;;  %v1218_v26 = vrot.slane %v1210_v47, %v7855_v4  ;;  %v1250_v31 = vrot.slane %v1242_v21, %v7855_v4 }
 0x28b   : > { %v587_v18 = vpop.permute.xlu1 %586  ;;  %v571_v19 = vpop.permute.xlu0 %570  ;;  %2546 = vxpose.xlu0.b32.end [2/2] (short) (narrow) %v7927_v62, 16  ;;  %v1291_v28 = vcombine.high %v1225_v27, %v8050_v17  ;;  %v1257_v30 = vrot.slane %v1243_v54, %v7855_v4  ;;  %v1290_v47 = vcombine.low %v1225_v27, %v8050_v17 }
 0x28c   : > { %v1258_v52 = vcombine.low %v547_v6, %v571_v19  ;;  %v1259_v22 = vcombine.high %v547_v6, %v571_v19  ;;  %v1274_v29 = vcombine.low %v1218_v26, %v1234_v8  ;;  %v1275_v25 = vcombine.high %v1218_v26, %v1234_v8 }
 0x28e   : > { %2885 = vxpose.xlu1.b32.end [2/2] (short) (narrow) %v1204_v45, 16  ;;  %v1266_v62 = vrot.slane %v1258_v52, %v7855_v4  ;;  %v1273_v36 = vrot.slane %v1259_v22, %v7855_v4  ;;  %v1282_v15 = vrot.slane %v1274_v29, %v7865_v20  ;;  %v1289_v19 = vrot.slane %v1275_v25, %v7865_v20 }
 0x28f   : > { %v611_v23 = vpop.permute.xlu1 %610  ;;  %v599_v24 = vpop.permute.xlu0 %598  ;;  %2771 = vxpose.xlu0.b32.start [1/2] (short) (narrow) %v1067_v32, 16 }
 0x290   : > { %v1362_v16 = vcombine.low %v587_v18, %v611_v23  ;;  %v1346_v39 = vcombine.low %v7807_v55, %v599_v24  ;;  %v1363_v40 = vcombine.high %v587_v18, %v611_v23  ;;  %v1347_v38 = vcombine.high %v7807_v55, %v599_v24 }
 0x291   : > { %v1306_v13 = vcombine.low %v1250_v31, %v1266_v62  ;;  %v8069_v18 = vrot.slane %v1291_v28, %v7865_v20  ;;  %v1307_v52 = vcombine.high %v1250_v31, %v1266_v62  ;;  %v1322_v8 = vcombine.low %v1257_v30, %v1273_v36 }
 0x292   : > { %3110 = vxpose.xlu1.b32.start [1/2] (short) (narrow) %v1070_v57, 16  ;;  %v1370_v58 = vrot.slane %v1362_v16, %v7855_v4  ;;  %v1354_v6 = vrot.slane %v1346_v39, %v7855_v4  ;;  %v1377_v55 = vrot.slane %v1363_v40, %v7855_v4  ;;  %v1361_v57 = vrot.slane %v1347_v38, %v7855_v4 }
 0x293   : > { %v635_v32 = vpop.permute.xlu1 %634  ;;  %v623_v45 = vpop.permute.xlu0 %622  ;;  %2772 = vxpose.xlu0.b32.end [2/2] (short) (narrow) %v1203_v60, 16  ;;  %v1323_v17 = vcombine.high %v1257_v30, %v1273_v36  ;;  %v1314_v54 = vrot.slane %v1306_v13, %v7865_v20  ;;  %v1321_v31 = vrot.slane %v1307_v52, %v7865_v20  ;;  %v1330_v36 = vrot.slane %v1322_v8, %v7865_v20 }
 0x294   : > { %v1410_v26 = vcombine.low %v1354_v6, %v1370_v58  ;;  %v1411_v27 = vcombine.high %v1354_v6, %v1370_v58  ;;  %v1426_v28 = vcombine.low %v1361_v57, %v1377_v55  ;;  %v1427_v29 = vcombine.high %v1361_v57, %v1377_v55 }
 0x295   : > { %v1337_v6 = vrot.slane %v1323_v17, %v7865_v20  ;;  %v1338_v52 = vcombine.low %v1282_v15, %v1314_v54  ;;  %v1340_v8 = vcombine.low %v1289_v19, %v1321_v31 }
 0x296   : > { %3111 = vxpose.xlu1.b32.end [2/2] (short) (narrow) %v8001_v63, 16  ;;  %v1418_v30 = vrot.slane %v1410_v26, %v7865_v20  ;;  %v1425_v58 = vrot.slane %v1411_v27, %v7865_v20 }
 0x297   : > { %v659_v60 = vpop.permute.xlu1 %658  ;;  %v647_v53 = vpop.permute.xlu0 %646  ;;  %2997 = vxpose.xlu0.b32.start [1/2] (short) (narrow) %v7996_v48, 16 }
 0x298   : > { %v1394_v21 = vcombine.low %v635_v32, %v659_v60  ;;  %v1395_v22 = vcombine.high %v635_v32, %v659_v60  ;;  %v1378_v23 = vcombine.low %v623_v45, %v647_v53  ;;  %v1379_v24 = vcombine.high %v623_v45, %v647_v53 }
 0x29a   : > { %v1402_v16 = vrot.slane %v1394_v21, %v7855_v4  ;;  %v1409_v39 = vrot.slane %v1395_v22, %v7855_v4  ;;  %v1386_v63 = vrot.slane %v1378_v23, %v7855_v4  ;;  %v1393_v62 = vrot.slane %v1379_v24, %v7855_v4  ;;  %3336 = vxpose.xlu1.b32.start [1/2] (short) (narrow) %v7999_v50, 16 }
 0x29b   : > { %v8081_v48 = vpop.permute.xlu1 %512  ;;  %v8083_v25 = vpop.permute.xlu0 %500  ;;  %2998 = vxpose.xlu0.b32.end [2/2] (short) (narrow) %v8003_v1, 16  ;;  %v1298_v50 = vrot.slane %v1290_v47, %v7865_v20  ;;  %v1434_v21 = vrot.slane %v1426_v28, %v7865_v20  ;;  %v1441_v47 = vrot.slane %v1427_v29, %v7865_v20  ;;  %v1339_v24 = vcombine.high %v1282_v15, %v1314_v54 }
 0x29c   : > { %v1442_v40 = vcombine.low %v1386_v63, %v1402_v16  ;;  %v1443_v38 = vcombine.high %v1386_v63, %v1402_v16  ;;  %v1458_v32 = vcombine.low %v1393_v62, %v1409_v39  ;;  %v1459_v45 = vcombine.high %v1393_v62, %v1409_v39 }
 0x29d   : > { %v8100_v17 = vcombine.low %v1298_v50, %v1330_v36  ;;  %v8114_v62 = vcombine.high %v1289_v19, %v1321_v31  ;;  %v8131_v19 = vcombine.high %v1298_v50, %v1330_v36  ;;  %v8134_v31 = vcombine.high %v8069_v18, %v1337_v6 }
 0x29e   : > { %v1450_v13 = vrot.slane %v1442_v40, %v7865_v20  ;;  %v1457_v55 = vrot.slane %v1443_v38, %v7865_v20  ;;  %v1466_v57 = vrot.slane %v1458_v32, %v7865_v20  ;;  %v1473_v60 = vrot.slane %v1459_v45, %v7865_v20  ;;  %3337 = vxpose.xlu1.b32.end [2/2] (short) (narrow) %v8005_v44, 16 }
 0x29f   : > { %v537_v53 = vpop.permute.xlu1 %536  ;;  %v525_v1 = vpop.permute.xlu0 %524  ;;  %3223 = vxpose.xlu0.b32.start [1/2] (short) (narrow) %v8026_v12, 16  ;;  %v8117_v12 = vcombine.low %v8069_v18, %v1337_v6 }
 0x2a0   : > { %v1474_v22 = vcombine.low %v1418_v30, %v1450_v13  ;;  %v1476_v23 = vcombine.low %v1425_v58, %v1457_v55  ;;  %v8102_v26 = vcombine.high %v1418_v30, %v1450_v13  ;;  %v8104_v27 = vcombine.low %v1434_v21, %v1466_v57 }
 0x2a1   : > { %v8106_v44 = vcombine.high %v1425_v58, %v1457_v55  ;;  %v8108_v16 = vcombine.low %v1441_v47, %v1473_v60  ;;  %v8126_v40 = vcombine.high %v1434_v21, %v1466_v57  ;;  %v8128_v38 = vcombine.high %v1441_v47, %v1473_v60 }
 0x2a2   : > { %v8110_v39 = vpack.c.bf16 %v1474_v22, %v1338_v52  ;;  %v8112_v63 = vpack.c.bf16 %v1476_v23, %v1340_v8  ;;  %3562 = vxpose.xlu1.b32.start [1/2] (short) (narrow) %v1338_v52, 16  ;;  %v8120_v28 = vpack.c.bf16 %v8102_v26, %v1339_v24  ;;  %v8124_v29 = vpack.c.bf16 %v8104_v27, %v8100_v17 }
 0x2a3   : > { %v561_v15 = vpop.permute.xlu1 %560  ;;  %v549_v54 = vpop.permute.xlu0 %548  ;;  %3224 = vxpose.xlu0.b32.end [2/2] (short) (narrow) %v8028_v14, 16  ;;  %v8138_v32 = vpack.c.bf16 %v8106_v44, %v8114_v62  ;;  %v8142_v45 = vpack.c.bf16 %v8108_v16, %v8117_v12  ;;  %v1498_v30 = vcombine.low %v8083_v25, %v525_v1  ;;  %v1499_v58 = vcombine.high %v8083_v25, %v525_v1 }
 0x2a4   : > { %v1514_v13 = vcombine.low %v537_v53, %v561_v15  ;;  %v1482_v14 = vcombine.low %v7741_v49, %v8081_v48  ;;  %v8150_v50 = vpack.c.bf16 %v8126_v40, %v8131_v19  ;;  %v8154_v6 = vpack.c.bf16 %v8128_v38, %v8134_v31 }
 0x2a5   : > { %v1483_v55 = vcombine.high %v7741_v49, %v8081_v48  ;;  %v1515_v57 = vcombine.high %v537_v53, %v561_v15  ;;  %v1506_v1 = vrot.slane %v1498_v30, %v7855_v4  ;;  %v1513_v52 = vrot.slane %v1499_v58, %v7855_v4 }
 0x2a6   : > { %3563 = vxpose.xlu1.b32.end [2/2] (short) (narrow) %v1474_v22, 16  ;;  %9017 = vst [vmem:[#allocation6_spill] sm:$0xff] %v8154_v6  ;;  %v1522_v21 = vrot.slane %v1514_v13, %v7855_v4  ;;  %v1490_v49 = vrot.slane %v1482_v14, %v7855_v4 }
 0x2a7   : > { %v589_v36 = vpop.permute.xlu1 %588  ;;  %v573_v18 = vpop.permute.xlu0 %572  ;;  %3449 = vxpose.xlu0.b32.start [1/2] (short) (narrow) %v8031_v56, 16  ;;  %v1497_v48 = vrot.slane %v1483_v55, %v7855_v4  ;;  %v1529_v56 = vrot.slane %v1515_v57, %v7855_v4 }
 0x2a8   : > { %v1530_v25 = vcombine.low %v549_v54, %v573_v18  ;;  %v1531_v60 = vcombine.high %v549_v54, %v573_v18  ;;  %v1546_v13 = vcombine.low %v1490_v49, %v1506_v1  ;;  %v1547_v18 = vcombine.high %v1490_v49, %v1506_v1 }
 0x2aa   : > { %v1538_v47 = vrot.slane %v1530_v25, %v7855_v4  ;;  %v1545_v22 = vrot.slane %v1531_v60, %v7855_v4  ;;  %3788 = vxpose.xlu1.b32.start [1/2] (short) (narrow) %v1340_v8, 16  ;;  %v1562_v8 = vcombine.low %v1497_v48, %v1513_v52  ;;  %v1563_v25 = vcombine.high %v1497_v48, %v1513_v52 }
 0x2ab   : > { %v613_v35 = vpop.permute.xlu1 %612  ;;  %v601_v42 = vpop.permute.xlu0 %600  ;;  %3450 = vxpose.xlu0.b32.end [2/2] (short) (narrow) %v8033_v10, 16  ;;  %v1561_v1 = vrot.slane %v1547_v18, %v7865_v20 }
 0x2ac   : > { %v1578_v53 = vcombine.low %v1522_v21, %v1538_v47  ;;  %v1634_v15 = vcombine.low %v589_v36, %v613_v35  ;;  %v1635_v54 = vcombine.high %v589_v36, %v613_v35  ;;  %v1618_v30 = vcombine.low %v7743_v51, %v601_v42 }
 0x2ad   : > { %v1619_v58 = vcombine.high %v7743_v51, %v601_v42  ;;  %v1579_v60 = vcombine.high %v1522_v21, %v1538_v47  ;;  %v1594_v34 = vcombine.low %v1529_v56, %v1545_v22  ;;  %v1595_v14 = vcombine.high %v1529_v56, %v1545_v22 }
 0x2ae   : > { %3789 = vxpose.xlu1.b32.end [2/2] (short) (narrow) %v1476_v23, 16  ;;  %v1586_v57 = vrot.slane %v1578_v53, %v7865_v20  ;;  %v1642_v10 = vrot.slane %v1634_v15, %v7855_v4  ;;  %v1649_v35 = vrot.slane %v1635_v54, %v7855_v4  ;;  %v1626_v36 = vrot.slane %v1618_v30, %v7855_v4 }
 0x2af   : > { %v637_v55 = vpop.permute.xlu1 %636  ;;  %v625_v6 = vpop.permute.xlu0 %624  ;;  %3675 = vxpose.xlu0.b32.start [1/2] (short) (narrow) %v1339_v24, 16  ;;  %v1633_v42 = vrot.slane %v1619_v58, %v7855_v4  ;;  %v1554_v51 = vrot.slane %v1546_v13, %v7865_v20  ;;  %v1570_v52 = vrot.slane %v1562_v8, %v7865_v20  ;;  %v1593_v21 = vrot.slane %v1579_v60, %v7865_v20 }
 0x2b0   : > { %v1602_v47 = vrot.slane %v1594_v34, %v7865_v20  ;;  %v1577_v22 = vrot.slane %v1563_v25, %v7865_v20  ;;  %v1609_v49 = vrot.slane %v1595_v14, %v7865_v20  ;;  %v1682_v54 = vcombine.low %v1626_v36, %v1642_v10 }
 0x2b1   : > { %v1683_v30 = vcombine.high %v1626_v36, %v1642_v10  ;;  %v1698_v58 = vcombine.low %v1633_v42, %v1649_v35  ;;  %v1699_v25 = vcombine.high %v1633_v42, %v1649_v35  ;;  %v1611_v60 = vcombine.high %v1554_v51, %v1586_v57 }
 0x2b2   : > { %4014 = vxpose.xlu1.b32.start [1/2] (short) (narrow) %v8100_v17, 16  ;;  %v1610_v17 = vcombine.low %v1554_v51, %v1586_v57  ;;  %v1614_v14 = vcombine.low %v1570_v52, %v1602_v47  ;;  %v1690_v36 = vrot.slane %v1682_v54, %v7865_v20  ;;  %v1616_v51 = vcombine.low %v1577_v22, %v1609_v49 }
 0x2b3   : > { %v661_v23 = vpop.permute.xlu1 %660  ;;  %v649_v24 = vpop.permute.xlu0 %648  ;;  %3676 = vxpose.xlu0.b32.end [2/2] (short) (narrow) %v8102_v26, 16  ;;  %v1612_v26 = vcombine.low %v1561_v1, %v1593_v21 }
 0x2b4   : > { %v1666_v48 = vcombine.low %v637_v55, %v661_v23  ;;  %v1667_v56 = vcombine.high %v637_v55, %v661_v23  ;;  %v1650_v53 = vcombine.low %v625_v6, %v649_v24  ;;  %v1651_v15 = vcombine.high %v625_v6, %v649_v24 }
 0x2b5   : > { %v1697_v24 = vrot.slane %v1683_v30, %v7865_v20 }
 0x2b6   : > { %v1674_v13 = vrot.slane %v1666_v48, %v7855_v4  ;;  %v1681_v18 = vrot.slane %v1667_v56, %v7855_v4  ;;  %v1658_v34 = vrot.slane %v1650_v53, %v7855_v4  ;;  %v1665_v8 = vrot.slane %v1651_v15, %v7855_v4  ;;  %4015 = vxpose.xlu1.b32.end [2/2] (short) (narrow) %v8104_v27, 16 }
 0x2b7   : > { %3901 = vxpose.xlu0.b32.start [1/2] (short) (narrow) %v8114_v62, 16  ;;  %v1613_v48 = vcombine.high %v1561_v1, %v1593_v21  ;;  %v1706_v56 = vrot.slane %v1698_v58, %v7865_v20  ;;  %v1615_v53 = vcombine.high %v1570_v52, %v1602_v47  ;;  %v1713_v62 = vrot.slane %v1699_v25, %v7865_v20 }
 0x2b8   : > { %v1714_v55 = vcombine.low %v1658_v34, %v1674_v13  ;;  %v1715_v6 = vcombine.high %v1658_v34, %v1674_v13  ;;  %v1730_v23 = vcombine.low %v1665_v8, %v1681_v18  ;;  %v1731_v10 = vcombine.high %v1665_v8, %v1681_v18 }
 0x2b9   : > { %v1617_v15 = vcombine.high %v1577_v22, %v1609_v49 }
 0x2ba   : > { %v1722_v35 = vrot.slane %v1714_v55, %v7865_v20  ;;  %v1729_v27 = vrot.slane %v1715_v6, %v7865_v20  ;;  %v1738_v57 = vrot.slane %v1730_v23, %v7865_v20  ;;  %v1745_v42 = vrot.slane %v1731_v10, %v7865_v20  ;;  %4240 = vxpose.xlu1.b32.start [1/2] (short) (narrow) %v8117_v12, 16 }
 0x2bb   : > { %3902 = vxpose.xlu0.b32.end [2/2] (short) (narrow) %v8106_v44, 16 }
 0x2bc   : > { %v1746_v1 = vcombine.low %v1690_v36, %v1722_v35  ;;  %v1748_v21 = vcombine.low %v1697_v24, %v1729_v27  ;;  %v1747_v54 = vcombine.high %v1690_v36, %v1722_v35  ;;  %v1750_v30 = vcombine.low %v1706_v56, %v1738_v57 }
 0x2bd   : > { %v1749_v58 = vcombine.high %v1697_v24, %v1729_v27  ;;  %v1752_v13 = vcombine.low %v1713_v62, %v1745_v42  ;;  %v1751_v18 = vcombine.high %v1706_v56, %v1738_v57  ;;  %v1753_v34 = vcombine.high %v1713_v62, %v1745_v42 }
 0x2be   : > { %v8200_v8 = vpack.c.bf16 %v1746_v1, %v1610_v17  ;;  %v8202_v55 = vpack.c.bf16 %v1748_v21, %v1612_v26  ;;  %v8204_v12 = vpack.c.bf16 %v1747_v54, %v1611_v60  ;;  %v8206_v52 = vpack.c.bf16 %v1750_v30, %v1614_v14  ;;  %4241 = vxpose.xlu1.b32.end [2/2] (short) (narrow) %v8108_v16, 16 }
 0x2bf   : > { %v8209_v47 = vpack.c.bf16 %v1749_v58, %v1613_v48  ;;  %v8211_v44 = vpack.c.bf16 %v1752_v13, %v1616_v51  ;;  %v8213_v22 = vpack.c.bf16 %v1751_v18, %v1615_v53  ;;  %v8215_v49 = vpack.c.bf16 %v1753_v34, %v1617_v15  ;;  %4127 = vxpose.xlu0.b32.start [1/2] (short) (narrow) %v8131_v19, 16 }
 0x2c2   : > { %4466 = vxpose.xlu1.b32.start [1/2] (short) (narrow) %v1610_v17, 16 }
 0x2c3   : > { %4128 = vxpose.xlu0.b32.end [2/2] (short) (narrow) %v8126_v40, 16 }
 0x2c6   : > { %4467 = vxpose.xlu1.b32.end [2/2] (short) (narrow) %v1746_v1, 16 }
 0x2c7   : > { %4353 = vxpose.xlu0.b32.start [1/2] (short) (narrow) %v8134_v31, 16 }
 0x2ca   : > { %4692 = vxpose.xlu1.b32.start [1/2] (short) (narrow) %v1612_v26, 16 }
 0x2cb   : > { %4354 = vxpose.xlu0.b32.end [2/2] (short) (narrow) %v8128_v38, 16 }
 0x2ce   : > { %4693 = vxpose.xlu1.b32.end [2/2] (short) (narrow) %v1748_v21, 16 }
 0x2cf   : > { %4579 = vxpose.xlu0.b32.start [1/2] (short) (narrow) %v1611_v60, 16 }
 0x2d2   : > { %4918 = vxpose.xlu1.b32.start [1/2] (short) (narrow) %v1614_v14, 16 }
 0x2d3   : > { %4580 = vxpose.xlu0.b32.end [2/2] (short) (narrow) %v1747_v54, 16 }
 0x2d6   : > { %4919 = vxpose.xlu1.b32.end [2/2] (short) (narrow) %v1750_v30, 16 }
 0x2d7   : > { %4805 = vxpose.xlu0.b32.start [1/2] (short) (narrow) %v1613_v48, 16 }
 0x2da   : > { %5144 = vxpose.xlu1.b32.start [1/2] (short) (narrow) %v1616_v51, 16 }
 0x2db   : > { %4806 = vxpose.xlu0.b32.end [2/2] (short) (narrow) %v1749_v58, 16 }
 0x2de   : > { %5145 = vxpose.xlu1.b32.end [2/2] (short) (narrow) %v1752_v13, 16 }
 0x2df   : > { %5031 = vxpose.xlu0.b32.start [1/2] (short) (narrow) %v1615_v53, 16 }
 0x2e3   : > { %5032 = vxpose.xlu0.b32.end [2/2] (short) (narrow) %v1751_v18, 16 }
 0x2e6   : > { %v1770_v16 = vpop.trf.xlu0 }
 0x2e7   : > { %7092 = vmatprep.mubr.msk.f32.mxu0 %vm266_vm0, %v1770_v16  ;;  %5257 = vxpose.xlu0.b32.start [1/2] (short) (narrow) %v1617_v15, 16 }
 0x2ea   : > { %v1771_v40 = vpop.trf.xlu0  ;;  %v1883_v19 = vpop.trf.xlu1 }
 0x2eb   : > { %7093 = vmatmul.mubr.msk.f32.vlgmr.msra.gmra.mrb[4].mxu0 %vm266_vm0, %v1771_v40  ;;  %5258 = vxpose.xlu0.b32.end [2/2] (short) (narrow) %v1753_v34, 16 }
 0x2ec   : > { %7331 = vmatpush3.bf16.msra.mxu0 %v7930_v0  ;;  %7099 = vmatprep.mubr.msk.f32.mxu0 %vm266_vm0, %v1883_v19 }
 0x2ed   : > { %7333 = vmatprep.subr.bf16.mxu0 %v7911_v33 }
 0x2ee   : > { %v1884_v38 = vpop.trf.xlu1 }
 0x2ef   : > { %v1996_v31 = vpop.trf.xlu0  ;;  %7100 = vmatmul.mubr.msk.f32.vlgmr.msra.gmra.mrb[6].mxu0 %vm266_vm0, %v1884_v38 }
 0x2f0   : > { %7335 = vmatpush3.bf16.msra.mxu0 %v7911_v33  ;;  %7106 = vmatprep.mubr.msk.f32.mxu0 %vm266_vm0, %v1996_v31 }
 0x2f1   : > { %7337 = vmatprep.subr.bf16.mxu0 %v7914_v37 }
 0x2f2   : > { %v2222_v17 = vpop.trf.xlu1 }
 0x2f3   : > { %v1997_v25 = vpop.trf.xlu0  ;;  %7120 = vmatprep.mubr.msk.f32.mxu1 %vm266_vm0, %v2222_v17 }
 0x2f4   : > { %7107 = vmatmul.mubr.msk.f32.vlgmr.msra.gmra.mrb[8].mxu0 %vm266_vm0, %v1997_v25 }
 0x2f5   : > { %7339 = vmatpush3.bf16.msra.mxu0 %v7914_v37 }
 0x2f6   : > { %7345 = vmatprep.subr.bf16.mxu0 %v7934_v61  ;;  %v2223_v0 = vpop.trf.xlu1 }
 0x2f7   : > { %v2109_v26 = vpop.trf.xlu0  ;;  %7121 = vmatmul.mubr.msk.f32.vlgmr.msra.gmra.mrb[8].mxu1 %vm266_vm0, %v2223_v0 }
 0x2f8   : > { %7113 = vmatprep.mubr.msk.f32.mxu0 %vm266_vm0, %v2109_v26  ;;  %7351 = vmatpush3.bf16.msra.mxu1 %v7925_v43 }
 0x2f9   : > { %7357 = vmatprep.subr.bf16.mxu1 %v8007_v2 }
 0x2fa   : > { %v2448_v33 = vpop.trf.xlu1 }
 0x2fb   : > { %v2110_v60 = vpop.trf.xlu0  ;;  %7134 = vmatprep.mubr.msk.f32.mxu1 %vm266_vm0, %v2448_v33 }
 0x2fc   : > { %7114 = vmatmul.mubr.msk.f32.vlgmr.msra.gmra.mrb[10].mxu0 %vm266_vm0, %v2110_v60 }
 0x2fd   : > { %7347 = vmatpush3.bf16.msra.mxu0 %v7934_v61 }
 0x2fe   : > { %7353 = vmatprep.subr.bf16.mxu0 %v7939_v3  ;;  %v2449_v37 = vpop.trf.xlu1 }
 0x2ff   : > { %v2335_v14 = vpop.trf.xlu0  ;;  %7135 = vmatmul.mubr.msk.f32.vlgmr.msra.gmra.mrb[10].mxu1 %vm266_vm0, %v2449_v37 }
 0x300   : > { %7127 = vmatprep.mubr.msk.f32.mxu0 %vm266_vm0, %v2335_v14  ;;  %7359 = vmatpush3.bf16.msra.mxu1 %v8007_v2 }
 0x301   : > { %7365 = vmatprep.subr.bf16.mxu1 %v8009_v5 }
 0x302   : > { %v2674_v43 = vpop.trf.xlu1 }
 0x303   : > { %v2336_v6 = vpop.trf.xlu0  ;;  %7148 = vmatprep.mubr.msk.f32.mxu1 %vm266_vm0, %v2674_v43 }
 0x304   : > { %7128 = vmatmul.mubr.msk.f32.vlgmr.msra.gmra.mrb[12].mxu0 %vm266_vm0, %v2336_v6 }
 0x305   : > { %7355 = vmatpush3.bf16.msra.mxu0 %v7939_v3 }
 0x306   : > { %7361 = vmatprep.subr.bf16.mxu0 %v8011_v7  ;;  %v2675_v61 = vpop.trf.xlu1 }
 0x307   : > { %v2561_v23 = vpop.trf.xlu0  ;;  %7149 = vmatmul.mubr.msk.f32.vlgmr.msra.gmra.mrb[12].mxu1 %vm266_vm0, %v2675_v61 }
 0x308   : > { %7141 = vmatprep.mubr.msk.f32.mxu0 %vm266_vm0, %v2561_v23  ;;  %7367 = vmatpush3.bf16.msra.mxu1 %v8009_v5 }
 0x309   : > { %7373 = vmatprep.subr.bf16.mxu1 %v8014_v46 }
 0x30a   : > { %v2900_v2 = vpop.trf.xlu1 }
 0x30b   : > { %v2562_v10 = vpop.trf.xlu0  ;;  %7162 = vmatprep.mubr.msk.f32.mxu1 %vm266_vm0, %v2900_v2 }
 0x30c   : > { %7142 = vmatmul.mubr.msk.f32.vlgmr.msra.gmra.mrb[14].mxu0 %vm266_vm0, %v2562_v10 }
 0x30d   : > { %7363 = vmatpush3.bf16.msra.mxu0 %v8011_v7 }
 0x30e   : > { %7369 = vmatprep.subr.bf16.mxu0 %v8018_v9  ;;  %v2901_v3 = vpop.trf.xlu1 }
 0x30f   : > { %v2787_v36 = vpop.trf.xlu0  ;;  %7163 = vmatmul.mubr.msk.f32.vlgmr.msra.gmra.mrb[14].mxu1 %vm266_vm0, %v2901_v3 }
 0x310   : > { %7155 = vmatprep.mubr.msk.f32.mxu0 %vm266_vm0, %v2787_v36  ;;  %7375 = vmatpush3.bf16.msra.mxu1 %v8014_v46 }
 0x311   : > { %7381 = vmatprep.subr.bf16.mxu1 %v8022_v11 }
 0x312   : > { %v3126_v5 = vpop.trf.xlu1 }
 0x313   : > { %v2788_v24 = vpop.trf.xlu0  ;;  %7176 = vmatprep.mubr.msk.f32.mxu1 %vm266_vm0, %v3126_v5 }
 0x314   : > { %7156 = vmatmul.mubr.msk.f32.vlgmr.msra.gmra.mrb[16].mxu0 %vm266_vm0, %v2788_v24 }
 0x315   : > { %7371 = vmatpush3.bf16.msra.mxu0 %v8018_v9 }
 0x316   : > { %7377 = vmatprep.subr.bf16.mxu0 %v8037_v41  ;;  %v3127_v7 = vpop.trf.xlu1 }
 0x317   : > { %v3013_v48 = vpop.trf.xlu0  ;;  %7177 = vmatmul.mubr.msk.f32.vlgmr.msra.gmra.mrb[16].mxu1 %vm266_vm0, %v3127_v7 }
 0x318   : > { %7169 = vmatprep.mubr.msk.f32.mxu0 %vm266_vm0, %v3013_v48  ;;  %7383 = vmatpush3.bf16.msra.mxu1 %v8022_v11 }
 0x319   : > { %7389 = vmatprep.subr.bf16.mxu1 %v8110_v39 }
 0x31a   : > { %v3352_v46 = vpop.trf.xlu1 }
 0x31b   : > { %v3014_v56 = vpop.trf.xlu0  ;;  %7190 = vmatprep.mubr.msk.f32.mxu1 %vm266_vm0, %v3352_v46 }
 0x31c   : > { %7170 = vmatmul.mubr.msk.f32.vlgmr.msra.gmra.mrb[18].mxu0 %vm266_vm0, %v3014_v56 }
 0x31d   : > { %7379 = vmatpush3.bf16.msra.mxu0 %v8037_v41 }
 0x31e   : > { %7385 = vmatprep.subr.bf16.mxu0 %v8041_v59  ;;  %v3353_v9 = vpop.trf.xlu1 }
 0x31f   : > { %v3239_v35 = vpop.trf.xlu0  ;;  %7191 = vmatmul.mubr.msk.f32.vlgmr.msra.gmra.mrb[18].mxu1 %vm266_vm0, %v3353_v9 }
 0x320   : > { %7183 = vmatprep.mubr.msk.f32.mxu0 %vm266_vm0, %v3239_v35  ;;  %7391 = vmatpush3.bf16.msra.mxu1 %v8110_v39 }
 0x321   : > { %7397 = vmatprep.subr.bf16.mxu1 %v8112_v63 }
 0x322   : > { %v3578_v11 = vpop.trf.xlu1 }
 0x323   : > { %v3240_v27 = vpop.trf.xlu0  ;;  %7204 = vmatprep.mubr.msk.f32.mxu1 %vm266_vm0, %v3578_v11 }
 0x324   : > { %7184 = vmatmul.mubr.msk.f32.vlgmr.msra.gmra.mrb[20].mxu0 %vm266_vm0, %v3240_v27 }
 0x325   : > { %7387 = vmatpush3.bf16.msra.mxu0 %v8041_v59 }
 0x326   : > { %7393 = vmatprep.subr.bf16.mxu0 %v8120_v28  ;;  %v3579_v41 = vpop.trf.xlu1 }
 0x327   : > { %v3465_v57 = vpop.trf.xlu0  ;;  %7205 = vmatmul.mubr.msk.f32.vlgmr.msra.gmra.mrb[20].mxu1 %vm266_vm0, %v3579_v41 }
 0x328   : > { %7197 = vmatprep.mubr.msk.f32.mxu0 %vm266_vm0, %v3465_v57  ;;  %7399 = vmatpush3.bf16.msra.mxu1 %v8112_v63 }
 0x329   : > { %7405 = vmatprep.subr.bf16.mxu1 %v8124_v29 }
 0x32a   : > { %v3804_v39 = vpop.trf.xlu1 }
 0x32b   : > { %v3466_v42 = vpop.trf.xlu0  ;;  %7218 = vmatprep.mubr.msk.f32.mxu1 %vm266_vm0, %v3804_v39 }
 0x32c   : > { %7198 = vmatmul.mubr.msk.f32.vlgmr.msra.gmra.mrb[22].mxu0 %vm266_vm0, %v3466_v42 }
 0x32d   : > { %7395 = vmatpush3.bf16.msra.mxu0 %v8120_v28 }
 0x32e   : > { %7401 = vmatprep.subr.bf16.mxu0 %v8138_v32  ;;  %v3805_v59 = vpop.trf.xlu1 }
 0x32f   : > { %v3691_v51 = vpop.trf.xlu0  ;;  %7219 = vmatmul.mubr.msk.f32.vlgmr.msra.gmra.mrb[22].mxu1 %vm266_vm0, %v3805_v59 }
 0x330   : > { %7211 = vmatprep.mubr.msk.f32.mxu0 %vm266_vm0, %v3691_v51  ;;  %7407 = vmatpush3.bf16.msra.mxu1 %v8124_v29 }
 0x331   : > { %7413 = vmatprep.subr.bf16.mxu1 %v8142_v45 }
 0x332   : > { %v4030_v63 = vpop.trf.xlu1 }
 0x333   : > { %v3692_v53 = vpop.trf.xlu0  ;;  %7232 = vmatprep.mubr.msk.f32.mxu1 %vm266_vm0, %v4030_v63 }
 0x334   : > { %7212 = vmatmul.mubr.msk.f32.vlgmr.msra.gmra.mrb[24].mxu0 %vm266_vm0, %v3692_v53 }
 0x335   : > { %7403 = vmatpush3.bf16.msra.mxu0 %v8138_v32  ;;  %v9018_v32 = vld [vmem:[#allocation6_spill] sm:$0xff] }
 0x336   : > { %7409 = vmatprep.subr.bf16.mxu0 %v8150_v50  ;;  %v4031_v28 = vpop.trf.xlu1 }
 0x337   : > { %v3917_v62 = vpop.trf.xlu0  ;;  %7233 = vmatmul.mubr.msk.f32.vlgmr.msra.gmra.mrb[24].mxu1 %vm266_vm0, %v4031_v28 }
 0x338   : > { %7225 = vmatprep.mubr.msk.f32.mxu0 %vm266_vm0, %v3917_v62  ;;  %7415 = vmatpush3.bf16.msra.mxu1 %v8142_v45 }
 0x339   : > { %7421 = vmatprep.subr.bf16.mxu1 %v8200_v8 }
 0x33a   : > { %v4256_v29 = vpop.trf.xlu1 }
 0x33b   : > { %v3918_v15 = vpop.trf.xlu0  ;;  %7246 = vmatprep.mubr.msk.f32.mxu1 %vm266_vm0, %v4256_v29 }
 0x33c   : > { %7226 = vmatmul.mubr.msk.f32.vlgmr.msra.gmra.mrb[26].mxu0 %vm266_vm0, %v3918_v15 }
 0x33d   : > { %7411 = vmatpush3.bf16.msra.mxu0 %v8150_v50 }
 0x33e   : > { %7417 = vmatprep.subr.bf16.mxu0 %v9018_v32  ;;  %v4257_v1 = vpop.trf.xlu1 }
 0x33f   : > { %v4143_v21 = vpop.trf.xlu0  ;;  %7247 = vmatmul.mubr.msk.f32.vlgmr.msra.gmra.mrb[26].mxu1 %vm266_vm0, %v4257_v1 }
 0x340   : > { %7239 = vmatprep.mubr.msk.f32.mxu0 %vm266_vm0, %v4143_v21  ;;  %7423 = vmatpush3.bf16.msra.mxu1 %v8200_v8 }
 0x341   : > { %7429 = vmatprep.subr.bf16.mxu1 %v8202_v55 }
 0x342   : > { %v4482_v45 = vpop.trf.xlu1 }
 0x343   : > { %v4144_v54 = vpop.trf.xlu0  ;;  %7260 = vmatprep.mubr.msk.f32.mxu1 %vm266_vm0, %v4482_v45 }
 0x344   : > { %7240 = vmatmul.mubr.msk.f32.vlgmr.msra.gmra.mrb[28].mxu0 %vm266_vm0, %v4144_v54 }
 0x345   : > { %7419 = vmatpush3.bf16.msra.mxu0 %v9018_v32 }
 0x346   : > { %7425 = vmatprep.subr.bf16.mxu0 %v8204_v12  ;;  %v4483_v50 = vpop.trf.xlu1 }
 0x347   : > { %v4369_v30 = vpop.trf.xlu0  ;;  %7261 = vmatmul.mubr.msk.f32.vlgmr.msra.gmra.mrb[28].mxu1 %vm266_vm0, %v4483_v50 }
 0x348   : > { %7253 = vmatprep.mubr.msk.f32.mxu0 %vm266_vm0, %v4369_v30  ;;  %7431 = vmatpush3.bf16.msra.mxu1 %v8202_v55 }
 0x349   : > { %7437 = vmatprep.subr.bf16.mxu1 %v8206_v52 }
 0x34a   : > { %v4708_v58 = vpop.trf.xlu1 }
 0x34b   : > { %v4370_v13 = vpop.trf.xlu0  ;;  %7274 = vmatprep.mubr.msk.f32.mxu1 %vm266_vm0, %v4708_v58 }
 0x34c   : > { %7254 = vmatmul.mubr.msk.f32.vlgmr.msra.gmra.mrb[30].mxu0 %vm266_vm0, %v4370_v13 }
 0x34d   : > { %7427 = vmatpush3.bf16.msra.mxu0 %v8204_v12 }
 0x34e   : > { %7433 = vmatprep.subr.bf16.mxu0 %v8209_v47  ;;  %v4709_v18 = vpop.trf.xlu1 }
 0x34f   : > { %v4595_v34 = vpop.trf.xlu0  ;;  %7275 = vmatmul.mubr.msk.f32.vlgmr.msra.gmra.mrb[30].mxu1 %vm266_vm0, %v4709_v18 }
 0x350   : > { %7267 = vmatprep.mubr.msk.f32.mxu0 %vm266_vm0, %v4595_v34  ;;  %7439 = vmatpush3.bf16.msra.mxu1 %v8206_v52 }
 0x351   : > { %7445 = vmatprep.subr.bf16.mxu1 %v8211_v44 }
 0x352   : > { %v4934_v8 = vpop.trf.xlu1 }
 0x353   : > { %v4596_v55 = vpop.trf.xlu0  ;;  %7288 = vmatprep.mubr.msk.f32.mxu1 %vm266_vm0, %v4934_v8 }
 0x354   : > { %7268 = vmatmul.mubr.msk.f32.vlgmr.msra.gmra.mrb[32].mxu0 %vm266_vm0, %v4596_v55 }
 0x355   : > { %7435 = vmatpush3.bf16.msra.mxu0 %v8209_v47 }
 0x356   : > { %7441 = vmatprep.subr.bf16.mxu0 %v8213_v22  ;;  %v4935_v12 = vpop.trf.xlu1 }
 0x357   : > { %v4821_v16 = vpop.trf.xlu0  ;;  %7289 = vmatmul.mubr.msk.f32.vlgmr.msra.gmra.mrb[32].mxu1 %vm266_vm0, %v4935_v12 }
 0x358   : > { %7281 = vmatprep.mubr.msk.f32.mxu0 %vm266_vm0, %v4821_v16  ;;  %7447 = vmatpush3.bf16.msra.mxu1 %v8211_v44 }
 0x35a   : > { %v5160_v52 = vpop.trf.xlu1 }
 0x35b   : > { %v4822_v40 = vpop.trf.xlu0  ;;  %7302 = vmatprep.mubr.msk.f32.mxu1 %vm266_vm0, %v5160_v52 }
 0x35c   : > { %7282 = vmatmul.mubr.msk.f32.vlgmr.msra.gmra.mrb[34].mxu0 %vm266_vm0, %v4822_v40 }
 0x35d   : > { %7443 = vmatpush3.bf16.msra.mxu0 %v8213_v22 }
 0x35e   : > { %7449 = vmatprep.subr.bf16.mxu0 %v8215_v49  ;;  %v5161_v47 = vpop.trf.xlu1 }
 0x35f   : > { %v5047_v19 = vpop.trf.xlu0  ;;  %7303 = vmatmul.mubr.msk.f32.vlgmr.msra.gmra.mrb[34].mxu1 %vm266_vm0, %v5161_v47 }
 0x360   : > { %7295 = vmatprep.mubr.msk.f32.mxu0 %vm266_vm0, %v5047_v19 }
 0x363   : > { %v5048_v38 = vpop.trf.xlu0 }
 0x364   : > { %7296 = vmatmul.mubr.msk.f32.vlgmr.msra.gmra.mrb[36].mxu0 %vm266_vm0, %v5048_v38 }
 0x365   : > { %7451 = vmatpush3.bf16.msra.mxu0 %v8215_v49 }
 0x367   : > { %v5273_v44 = vpop.trf.xlu0 }
 0x368   : > { %7309 = vmatprep.mubr.msk.f32.mxu0 %vm266_vm0, %v5273_v44 }
 0x36b   : > { %v5274_v31 = vpop.trf.xlu0 }
 0x36c   : > { %7310 = vmatmul.mubr.msk.f32.vlgmr.msra.gmra.mrb[38].mxu0 %vm266_vm0, %v5274_v31 }
 0x3be   : > { %v7094_v22 = vpop.f32.mrb[4].mxu0 }
 0x3bf   : > { %v1858_v17 = vpop.f32.mrb[5].mxu0 }
 0x3c2   : > { %v7101_v25 = vpop.f32.mrb[6].mxu0 }
 0x3c3   : > { %v1971_v0 = vpop.f32.mrb[7].mxu0 }
 0x3c7   : > { %v7108_v26 = vpop.f32.mrb[8].mxu0 }
 0x3c8   : > { %v5914_v33 = vcombine.low %v7094_v22, %v7108_v26  ;;  %v5915_v60 = vcombine.high %v7094_v22, %v7108_v26  ;;  %v2084_v37 = vpop.f32.mrb[9].mxu0 }
 0x3c9   : > { %v5370_v14 = vcombine.low %v1858_v17, %v2084_v37  ;;  %v5371_v43 = vcombine.high %v1858_v17, %v2084_v37 }
 0x3ca   : > { %v7122_v6 = vpop.f32.mrb[8].mxu1  ;;  %v5922_v3 = vrot.slane %v5914_v33, %v7855_v4  ;;  %v5929_v36 = vrot.slane %v5915_v60, %v7855_v4 }
 0x3cb   : > { %v2310_v61 = vpop.f32.mrb[9].mxu1  ;;  %v8346_v7 = vrot.slane %v5370_v14, %v7855_v4  ;;  %v8349_v48 = vrot.slane %v5371_v43, %v7855_v4 }
 0x3cf   : > { %v7115_v23 = vpop.f32.mrb[10].mxu0 }
 0x3d0   : > { %v5930_v49 = vcombine.low %v7101_v25, %v7115_v23  ;;  %v5931_v2 = vcombine.high %v7101_v25, %v7115_v23  ;;  %v2197_v10 = vpop.f32.mrb[11].mxu0 }
 0x3d1   : > { %v5386_v5 = vcombine.low %v1971_v0, %v2197_v10  ;;  %v5387_v24 = vcombine.high %v1971_v0, %v2197_v10 }
 0x3d2   : > { %v5938_v46 = vrot.slane %v5930_v49, %v7855_v4  ;;  %v5945_v56 = vrot.slane %v5931_v2, %v7855_v4  ;;  %v7136_v9 = vpop.f32.mrb[10].mxu1 }
 0x3d3   : > { %v8354_v35 = vrot.slane %v5386_v5, %v7855_v4  ;;  %v8357_v11 = vrot.slane %v5387_v24, %v7855_v4  ;;  %v5946_v27 = vcombine.low %v7122_v6, %v7136_v9  ;;  %v5947_v41 = vcombine.high %v7122_v6, %v7136_v9  ;;  %v2536_v57 = vpop.f32.mrb[11].mxu1 }
 0x3d4   : > { %v5978_v39 = vcombine.low %v5922_v3, %v5938_v46  ;;  %v5979_v42 = vcombine.high %v5922_v3, %v5938_v46  ;;  %v5994_v59 = vcombine.low %v5929_v36, %v5945_v56  ;;  %v5995_v51 = vcombine.high %v5929_v36, %v5945_v56 }
 0x3d5   : > { %v5434_v63 = vcombine.low %v8346_v7, %v8354_v35  ;;  %v5435_v53 = vcombine.high %v8346_v7, %v8354_v35  ;;  %v5450_v28 = vcombine.low %v8349_v48, %v8357_v11  ;;  %v5451_v62 = vcombine.high %v8349_v48, %v8357_v11 }
 0x3d6   : > { %v5402_v15 = vcombine.low %v2310_v61, %v2536_v57  ;;  %v5403_v32 = vcombine.high %v2310_v61, %v2536_v57  ;;  %v8372_v54 = vrot.slane %v5978_v39, %v7865_v20  ;;  %v8375_v50 = vrot.slane %v5979_v42, %v7865_v20 }
 0x3d7   : > { %v7129_v29 = vpop.f32.mrb[12].mxu0  ;;  %v8378_v58 = vrot.slane %v5994_v59, %v7865_v20  ;;  %v6009_v13 = vrot.slane %v5995_v51, %v7865_v20  ;;  %v5954_v55 = vrot.slane %v5946_v27, %v7855_v4  ;;  %v5961_v12 = vrot.slane %v5947_v41, %v7855_v4 }
 0x3d8   : > { %v2423_v1 = vpop.f32.mrb[13].mxu0  ;;  %v5410_v40 = vrot.slane %v5402_v15, %v7855_v4  ;;  %v5417_v47 = vrot.slane %v5403_v32, %v7855_v4  ;;  %v8392_v23 = vrot.slane %v5435_v53, %v7865_v20  ;;  %v8400_v3 = vrot.slane %v5450_v28, %v7865_v20 }
 0x3d9   : > { %v8423_v39 = vrot.slane %v5434_v63, %v7865_v20  ;;  %v8426_v42 = vrot.slane %v5451_v62, %v7865_v20 }
 0x3da   : > { %v8367_v21 = vpop.f32.mrb[12].mxu1 }
 0x3db   : > { %v8369_v45 = vpop.f32.mrb[13].mxu1 }
 0x3df   : > { %v7143_v30 = vpop.f32.mrb[14].mxu0 }
 0x3e0   : > { %v5962_v18 = vcombine.low %v7129_v29, %v7143_v30  ;;  %v5963_v34 = vcombine.high %v7129_v29, %v7143_v30  ;;  %v2649_v8 = vpop.f32.mrb[15].mxu0 }
 0x3e1   : > { %v5418_v16 = vcombine.low %v2423_v1, %v2649_v8  ;;  %v5419_v52 = vcombine.high %v2423_v1, %v2649_v8 }
 0x3e2   : > { %v5970_v19 = vrot.slane %v5962_v18, %v7855_v4  ;;  %v5977_v38 = vrot.slane %v5963_v34, %v7855_v4  ;;  %v7164_v44 = vpop.f32.mrb[14].mxu1 }
 0x3e3   : > { %v5426_v31 = vrot.slane %v5418_v16, %v7855_v4  ;;  %v5433_v22 = vrot.slane %v5419_v52, %v7855_v4  ;;  %v6050_v17 = vcombine.low %v8367_v21, %v7164_v44  ;;  %v6051_v25 = vcombine.high %v8367_v21, %v7164_v44  ;;  %v2988_v0 = vpop.f32.mrb[15].mxu1 }
 0x3e4   : > { %v6010_v26 = vcombine.low %v5954_v55, %v5970_v19  ;;  %v6011_v33 = vcombine.high %v5954_v55, %v5970_v19  ;;  %v6026_v60 = vcombine.low %v5961_v12, %v5977_v38  ;;  %v6027_v37 = vcombine.high %v5961_v12, %v5977_v38 }
 0x3e5   : > { %v5466_v14 = vcombine.low %v5410_v40, %v5426_v31  ;;  %v5467_v43 = vcombine.high %v5410_v40, %v5426_v31  ;;  %v5482_v6 = vcombine.low %v5417_v47, %v5433_v22  ;;  %v5483_v61 = vcombine.high %v5417_v47, %v5433_v22 }
 0x3e6   : > { %v8395_v49 = vrot.slane %v6010_v26, %v7865_v20  ;;  %v6025_v2 = vrot.slane %v6011_v33, %v7865_v20  ;;  %v6041_v10 = vrot.slane %v6027_v37, %v7865_v20  ;;  %v8403_v36 = vrot.slane %v6026_v60, %v7865_v20 }
 0x3e7   : > { %v8406_v5 = vrot.slane %v5467_v43, %v7865_v20  ;;  %v8409_v24 = vrot.slane %v5482_v6, %v7865_v20  ;;  %v7157_v7 = vpop.f32.mrb[16].mxu0  ;;  %v8412_v48 = vrot.slane %v5466_v14, %v7865_v20  ;;  %v8415_v46 = vrot.slane %v5483_v61, %v7865_v20 }
 0x3e8   : > { %v5506_v56 = vcombine.low %v8369_v45, %v2988_v0  ;;  %v5507_v9 = vcombine.high %v8369_v45, %v2988_v0  ;;  %v2875_v35 = vpop.f32.mrb[17].mxu0  ;;  %v6048_v11 = vcombine.low %v6009_v13, %v6041_v10  ;;  %v6043_v27 = vcombine.high %v8372_v54, %v8395_v49 }
 0x3e9   : > { %v6049_v41 = vcombine.high %v6009_v13, %v6041_v10  ;;  %v6044_v57 = vcombine.low %v8375_v50, %v6025_v2  ;;  %v6045_v59 = vcombine.high %v8375_v50, %v6025_v2  ;;  %v5501_v51 = vcombine.high %v8392_v23, %v8406_v5 }
 0x3ea   : > { %v8431_v53 = vpop.f32.mrb[16].mxu1  ;;  %6654 = vrot.lane.b32.xlu0 %v6048_v11, %s7578_s11  ;;  %6574 = vrot.lane.b32.xlu1 %v6043_v27, %s7581_s14  ;;  %v6046_v63 = vcombine.low %v8378_v58, %v8403_v36  ;;  %v5502_v62 = vcombine.low %v8400_v3, %v8409_v24  ;;  %v6047_v29 = vcombine.high %v8378_v58, %v8403_v36 }
 0x3eb   : > { %v8435_v28 = vpop.f32.mrb[17].mxu1  ;;  %v5503_v15 = vcombine.high %v8400_v3, %v8409_v24  ;;  %v5504_v32 = vcombine.low %v8426_v42, %v8415_v46  ;;  %v5499_v1 = vcombine.high %v8423_v39, %v8412_v48  ;;  %v5505_v21 = vcombine.high %v8426_v42, %v8415_v46 }
 0x3ec   : > { %v5500_v45 = vcombine.low %v8392_v23, %v8406_v5  ;;  %v6042_v50 = vcombine.low %v8372_v54, %v8395_v49  ;;  %v5498_v30 = vcombine.low %v8423_v39, %v8412_v48  ;;  %v6058_v8 = vrot.slane %v6050_v17, %v7855_v4 }
 0x3ed   : > { %v6065_v55 = vrot.slane %v6051_v25, %v7855_v4  ;;  %v8462_v52 = vrot.slane %v5506_v56, %v7855_v4  ;;  %v8465_v40 = vrot.slane %v5507_v9, %v7855_v4 }
 0x3ee   : > { %6670 = vrot.lane.b32.xlu0 %v6049_v41, %s7576_s9  ;;  %6590 = vrot.lane.b32.xlu1 %v6044_v57, %s7579_s12 }
 0x3ef   : > { %v7171_v58 = vpop.f32.mrb[18].mxu0 }
 0x3f0   : > { %v6066_v13 = vcombine.low %v7157_v7, %v7171_v58  ;;  %v6067_v18 = vcombine.high %v7157_v7, %v7171_v58  ;;  %v3101_v34 = vpop.f32.mrb[19].mxu0 }
 0x3f1   : > { %v5522_v12 = vcombine.low %v2875_v35, %v3101_v34  ;;  %v5523_v16 = vcombine.high %v2875_v35, %v3101_v34 }
 0x3f2   : > { %v6074_v47 = vrot.slane %v6066_v13, %v7855_v4  ;;  %v6081_v19 = vrot.slane %v6067_v18, %v7855_v4  ;;  %v7192_v38 = vpop.f32.mrb[18].mxu1  ;;  %6606 = vrot.lane.b32.xlu1 %v6045_v59, %s7580_s13  ;;  %6494 = vrot.lane.b32.xlu0 %v5501_v51, %s7580_s13 }
 0x3f3   : > { %v8470_v44 = vrot.slane %v5522_v12, %v7855_v4  ;;  %v8473_v31 = vrot.slane %v5523_v16, %v7855_v4  ;;  %v6082_v22 = vcombine.low %v8431_v53, %v7192_v38  ;;  %v3440_v17 = vpop.f32.mrb[19].mxu1  ;;  %v6083_v61 = vcombine.high %v8431_v53, %v7192_v38 }
 0x3f4   : > { %v6114_v25 = vcombine.low %v6058_v8, %v6074_v47  ;;  %v6115_v0 = vcombine.high %v6058_v8, %v6074_v47  ;;  %v6130_v26 = vcombine.low %v6065_v55, %v6081_v19  ;;  %v6131_v33 = vcombine.high %v6065_v55, %v6081_v19 }
 0x3f5   : > { %v5570_v60 = vcombine.low %v8462_v52, %v8470_v44  ;;  %v5571_v37 = vcombine.high %v8462_v52, %v8470_v44  ;;  %v5586_v14 = vcombine.low %v8465_v40, %v8473_v31  ;;  %v5587_v43 = vcombine.high %v8465_v40, %v8473_v31 }
 0x3f6   : > { %6622 = vrot.lane.b32.xlu1 %v6046_v63, %s7577_s10  ;;  %6510 = vrot.lane.b32.xlu0 %v5502_v62, %s7577_s10  ;;  %v5538_v2 = vcombine.low %v8435_v28, %v3440_v17  ;;  %v5539_v10 = vcombine.high %v8435_v28, %v3440_v17  ;;  %v8498_v7 = vrot.slane %v6114_v25, %v7865_v20 }
 0x3f7   : > { %v7185_v6 = vpop.f32.mrb[20].mxu0  ;;  %v8501_v56 = vrot.slane %v6115_v0, %v7865_v20  ;;  %v8505_v35 = vrot.slane %v6130_v26, %v7865_v20  ;;  %v8508_v11 = vrot.slane %v6131_v33, %v7865_v20  ;;  %v6090_v59 = vrot.slane %v6082_v22, %v7855_v4 }
 0x3f8   : > { %v3327_v3 = vpop.f32.mrb[21].mxu0  ;;  %v6097_v51 = vrot.slane %v6083_v61, %v7855_v4  ;;  %v5546_v63 = vrot.slane %v5538_v2, %v7855_v4  ;;  %v5553_v62 = vrot.slane %v5539_v10, %v7855_v4  ;;  %v8530_v23 = vrot.slane %v5570_v60, %v7865_v20 }
 0x3f9   : > { %v8538_v22 = vrot.slane %v5571_v37, %v7865_v20  ;;  %v8564_v10 = vrot.slane %v5586_v14, %v7865_v20 }
 0x3fa   : > { %v8491_v36 = vpop.f32.mrb[20].mxu1  ;;  %6638 = vrot.lane.b32.xlu1 %v6047_v29, %s7575_s29  ;;  %6526 = vrot.lane.b32.xlu0 %v5503_v15, %s7575_s29 }
 0x3fb   : > { %v8494_v24 = vpop.f32.mrb[21].mxu1 }
 0x3fe   : > { %6462 = vrot.lane.b32.xlu1 %v5499_v1, %s7581_s14  ;;  %6542 = vrot.lane.b32.xlu0 %v5504_v32, %s7578_s11 }
 0x3ff   : > { %v7199_v9 = vpop.f32.mrb[22].mxu0 }
 0x400   : > { %v6098_v27 = vcombine.low %v7185_v6, %v7199_v9  ;;  %v6099_v41 = vcombine.high %v7185_v6, %v7199_v9  ;;  %v3553_v57 = vpop.f32.mrb[23].mxu0 }
 0x401   : > { %v5554_v53 = vcombine.low %v3327_v3, %v3553_v57  ;;  %v5555_v28 = vcombine.high %v3327_v3, %v3553_v57  ;;  %v8570_v3 = vrot.slane %v5587_v43, %v7865_v20 }
 0x402   : > { %v6106_v29 = vrot.slane %v6098_v27, %v7855_v4  ;;  %v6113_v15 = vrot.slane %v6099_v41, %v7855_v4  ;;  %v7220_v1 = vpop.f32.mrb[22].mxu1  ;;  %6478 = vrot.lane.b32.xlu1 %v5500_v45, %s7579_s12  ;;  %6558 = vrot.lane.b32.xlu0 %v5505_v21, %s7576_s9 }
 0x403   : > { %v5562_v32 = vrot.slane %v5554_v53, %v7855_v4  ;;  %v5569_v58 = vrot.slane %v5555_v28, %v7855_v4  ;;  %v6186_v13 = vcombine.low %v8491_v36, %v7220_v1  ;;  %v6187_v18 = vcombine.high %v8491_v36, %v7220_v1  ;;  %v3892_v34 = vpop.f32.mrb[23].mxu1 }
 0x404   : > { %v6146_v8 = vcombine.low %v6090_v59, %v6106_v29  ;;  %v6147_v55 = vcombine.high %v6090_v59, %v6106_v29  ;;  %v6162_v12 = vcombine.low %v6097_v51, %v6113_v15  ;;  %v6163_v16 = vcombine.high %v6097_v51, %v6113_v15 }
 0x405   : > { %v5602_v52 = vcombine.low %v5546_v63, %v5562_v32  ;;  %v5603_v47 = vcombine.high %v5546_v63, %v5562_v32  ;;  %v5618_v19 = vcombine.low %v5553_v62, %v5569_v58  ;;  %v5619_v38 = vcombine.high %v5553_v62, %v5569_v58 }
 0x406   : > { %v8533_v5 = vrot.slane %v6146_v8, %v7865_v20  ;;  %v6161_v45 = vrot.slane %v6147_v55, %v7865_v20  ;;  %v6177_v44 = vrot.slane %v6163_v16, %v7865_v20  ;;  %v8541_v46 = vrot.slane %v6162_v12, %v7865_v20 }
 0x407   : > { %v8544_v42 = vrot.slane %v5602_v52, %v7865_v20  ;;  %v5617_v21 = vrot.slane %v5603_v47, %v7865_v20  ;;  %v7213_v17 = vpop.f32.mrb[24].mxu0  ;;  %v8548_v25 = vrot.slane %v5618_v19, %v7865_v20  ;;  %v8551_v0 = vrot.slane %v5619_v38, %v7865_v20 }
 0x408   : > { %v5642_v26 = vcombine.low %v8494_v24, %v3892_v34  ;;  %v5643_v33 = vcombine.high %v8494_v24, %v3892_v34  ;;  %v3779_v60 = vpop.f32.mrb[25].mxu0  ;;  %v6184_v37 = vcombine.low %v8508_v11, %v6177_v44  ;;  %v6179_v6 = vcombine.high %v8498_v7, %v8533_v5 }
 0x409   : > { %v6185_v61 = vcombine.high %v8508_v11, %v6177_v44  ;;  %v6180_v2 = vcombine.low %v8501_v56, %v6161_v45  ;;  %v6181_v36 = vcombine.high %v8501_v56, %v6161_v45  ;;  %v5636_v24 = vcombine.low %v8538_v22, %v5617_v21 }
 0x40a   : > { %v8574_v9 = vpop.f32.mrb[24].mxu1  ;;  %6656 = vrot.lane.b32.xlu1 %v6184_v37, %s7578_s11  ;;  %6576 = vrot.lane.b32.xlu0 %v6179_v6, %s7581_s14  ;;  %v6182_v14 = vcombine.low %v8505_v35, %v8541_v46  ;;  %v5637_v27 = vcombine.high %v8538_v22, %v5617_v21  ;;  %v6183_v40 = vcombine.high %v8505_v35, %v8541_v46 }
 0x40b   : > { %v8578_v11 = vpop.f32.mrb[25].mxu1  ;;  %v5638_v31 = vcombine.low %v8564_v10, %v8548_v25  ;;  %v5639_v43 = vcombine.high %v8564_v10, %v8548_v25  ;;  %v5635_v56 = vcombine.high %v8530_v23, %v8544_v42  ;;  %v5640_v41 = vcombine.low %v8570_v3, %v8551_v0 }
 0x40c   : > { %v5641_v57 = vcombine.high %v8570_v3, %v8551_v0  ;;  %v6178_v59 = vcombine.low %v8498_v7, %v8533_v5  ;;  %v5634_v35 = vcombine.low %v8530_v23, %v8544_v42  ;;  %v6194_v62 = vrot.slane %v6186_v13, %v7855_v4 }
 0x40d   : > { %v6201_v29 = vrot.slane %v6187_v18, %v7855_v4  ;;  %v8604_v32 = vrot.slane %v5642_v26, %v7855_v4  ;;  %v8607_v58 = vrot.slane %v5643_v33, %v7855_v4 }
 0x40e   : > { %6672 = vrot.lane.b32.xlu1 %v6185_v61, %s7576_s9  ;;  %6592 = vrot.lane.b32.xlu0 %v6180_v2, %s7579_s12 }
 0x40f   : > { %v7227_v51 = vpop.f32.mrb[26].mxu0 }
 0x410   : > { %v6202_v53 = vcombine.low %v7213_v17, %v7227_v51  ;;  %v6203_v28 = vcombine.high %v7213_v17, %v7227_v51  ;;  %v4005_v63 = vpop.f32.mrb[27].mxu0 }
 0x411   : > { %v5658_v15 = vcombine.low %v3779_v60, %v4005_v63  ;;  %v5659_v1 = vcombine.high %v3779_v60, %v4005_v63 }
 0x412   : > { %v6210_v34 = vrot.slane %v6202_v53, %v7855_v4  ;;  %v6217_v8 = vrot.slane %v6203_v28, %v7855_v4  ;;  %v7248_v55 = vpop.f32.mrb[26].mxu1  ;;  %6608 = vrot.lane.b32.xlu0 %v6181_v36, %s7580_s13  ;;  %6480 = vrot.lane.b32.xlu1 %v5636_v24, %s7579_s12 }
 0x413   : > { %v8612_v12 = vrot.slane %v5658_v15, %v7855_v4  ;;  %v8615_v13 = vrot.slane %v5659_v1, %v7855_v4  ;;  %v6218_v18 = vcombine.low %v8574_v9, %v7248_v55  ;;  %v4344_v16 = vpop.f32.mrb[27].mxu1  ;;  %v6219_v17 = vcombine.high %v8574_v9, %v7248_v55 }
 0x414   : > { %v6250_v52 = vcombine.low %v6194_v62, %v6210_v34  ;;  %v6251_v47 = vcombine.high %v6194_v62, %v6210_v34  ;;  %v6266_v19 = vcombine.low %v6201_v29, %v6217_v8  ;;  %v6267_v38 = vcombine.high %v6201_v29, %v6217_v8 }
 0x415   : > { %v5706_v45 = vcombine.low %v8604_v32, %v8612_v12  ;;  %v5707_v44 = vcombine.high %v8604_v32, %v8612_v12  ;;  %v5722_v22 = vcombine.low %v8607_v58, %v8615_v13  ;;  %v5723_v46 = vcombine.high %v8607_v58, %v8615_v13 }
 0x416   : > { %6624 = vrot.lane.b32.xlu0 %v6182_v14, %s7577_s10  ;;  %6496 = vrot.lane.b32.xlu1 %v5637_v27, %s7580_s13  ;;  %v5674_v25 = vcombine.low %v8578_v11, %v4344_v16  ;;  %v5675_v26 = vcombine.high %v8578_v11, %v4344_v16  ;;  %v8640_v6 = vrot.slane %v6250_v52, %v7865_v20 }
 0x417   : > { %v7241_v21 = vpop.f32.mrb[28].mxu0  ;;  %v8643_v61 = vrot.slane %v6251_v47, %v7865_v20  ;;  %v8647_v10 = vrot.slane %v6266_v19, %v7865_v20  ;;  %v8650_v36 = vrot.slane %v6267_v38, %v7865_v20  ;;  %v6226_v14 = vrot.slane %v6218_v18, %v7855_v4 }
 0x418   : > { %v4231_v33 = vpop.f32.mrb[29].mxu0  ;;  %v6233_v27 = vrot.slane %v6219_v17, %v7855_v4  ;;  %v5689_v51 = vrot.slane %v5675_v26, %v7855_v4  ;;  %v5721_v38 = vrot.slane %v5707_v44, %v7865_v20  ;;  %v8676_v26 = vrot.slane %v5722_v22, %v7865_v20 }
 0x419   : > { %v8706_v0 = vrot.slane %v5706_v45, %v7865_v20  ;;  %v8712_v3 = vrot.slane %v5723_v46, %v7865_v20 }
 0x41a   : > { %v8633_v60 = vpop.f32.mrb[28].mxu1  ;;  %6640 = vrot.lane.b32.xlu0 %v6183_v40, %s7575_s29  ;;  %6512 = vrot.lane.b32.xlu1 %v5638_v31, %s7577_s10 }
 0x41b   : > { %v8636_v37 = vpop.f32.mrb[29].mxu1 }
 0x41e   : > { %6464 = vrot.lane.b32.xlu0 %v5635_v56, %s7581_s14  ;;  %6528 = vrot.lane.b32.xlu1 %v5639_v43, %s7575_s29  ;;  %v5682_v56 = vrot.slane %v5674_v25, %v7855_v4 }
 0x41f   : > { %v7255_v2 = vpop.f32.mrb[30].mxu0 }
 0x420   : > { %v6234_v24 = vcombine.low %v7241_v21, %v7255_v2  ;;  %v6235_v9 = vcombine.high %v7241_v21, %v7255_v2  ;;  %v4457_v11 = vpop.f32.mrb[31].mxu0 }
 0x421   : > { %v5690_v40 = vcombine.low %v4231_v33, %v4457_v11  ;;  %v5691_v31 = vcombine.high %v4231_v33, %v4457_v11 }
 0x422   : > { %v6242_v53 = vrot.slane %v6234_v24, %v7855_v4  ;;  %v6249_v28 = vrot.slane %v6235_v9, %v7855_v4  ;;  %v7276_v63 = vpop.f32.mrb[30].mxu1  ;;  %6544 = vrot.lane.b32.xlu1 %v5640_v41, %s7578_s11 }
 0x423   : > { %v5698_v43 = vrot.slane %v5690_v40, %v7855_v4  ;;  %v5705_v62 = vrot.slane %v5691_v31, %v7855_v4  ;;  %v6322_v29 = vcombine.low %v8633_v60, %v7276_v63  ;;  %v6323_v15 = vcombine.high %v8633_v60, %v7276_v63  ;;  %v4796_v1 = vpop.f32.mrb[31].mxu1 }
 0x424   : > { %v6282_v34 = vcombine.low %v6226_v14, %v6242_v53  ;;  %v6283_v8 = vcombine.high %v6226_v14, %v6242_v53  ;;  %v6298_v55 = vcombine.low %v6233_v27, %v6249_v28  ;;  %v6299_v18 = vcombine.high %v6233_v27, %v6249_v28 }
 0x425   : > { %v5738_v16 = vcombine.low %v5682_v56, %v5698_v43  ;;  %v5739_v52 = vcombine.high %v5682_v56, %v5698_v43  ;;  %v5754_v47 = vcombine.low %v5689_v51, %v5705_v62  ;;  %v5755_v19 = vcombine.high %v5689_v51, %v5705_v62 }
 0x426   : > { %v8669_v21 = vrot.slane %v6282_v34, %v7865_v20  ;;  %v6297_v17 = vrot.slane %v6283_v8, %v7865_v20  ;;  %v8673_v25 = vrot.slane %v6299_v18, %v7865_v20  ;;  %v8679_v33 = vrot.slane %v6298_v55, %v7865_v20  ;;  %6560 = vrot.lane.b32.xlu1 %v5641_v57, %s7576_s9 }
 0x427   : > { %v5753_v41 = vrot.slane %v5739_v52, %v7865_v20  ;;  %v8683_v60 = vrot.slane %v5754_v47, %v7865_v20  ;;  %v7269_v44 = vpop.f32.mrb[32].mxu0  ;;  %v8686_v2 = vrot.slane %v5738_v16, %v7865_v20  ;;  %v8689_v24 = vrot.slane %v5755_v19, %v7865_v20 }
 0x428   : > { %v5778_v22 = vcombine.low %v8636_v37, %v4796_v1  ;;  %v5779_v9 = vcombine.high %v8636_v37, %v4796_v1  ;;  %v4683_v11 = vpop.f32.mrb[33].mxu0  ;;  %v6320_v14 = vcombine.low %v8650_v36, %v8673_v25  ;;  %v6315_v27 = vcombine.high %v8640_v6, %v8669_v21 }
 0x429   : > { %v6316_v40 = vcombine.low %v8643_v61, %v6297_v17  ;;  %v5772_v31 = vcombine.low %v5721_v38, %v5753_v41  ;;  %v6317_v57 = vcombine.high %v8643_v61, %v6297_v17  ;;  %v5773_v37 = vcombine.high %v5721_v38, %v5753_v41 }
 0x42a   : > { %v8715_v56 = vpop.f32.mrb[32].mxu1  ;;  %6658 = vrot.lane.b32.xlu0 %v6320_v14, %s7578_s11  ;;  %v6318_v32 = vcombine.low %v8647_v10, %v8679_v33  ;;  %v5774_v12 = vcombine.low %v8676_v26, %v8683_v60  ;;  %v6319_v58 = vcombine.high %v8647_v10, %v8679_v33  ;;  %v5775_v13 = vcombine.high %v8676_v26, %v8683_v60 }
 0x42b   : > { %v8718_v51 = vpop.f32.mrb[33].mxu1  ;;  %6578 = vrot.lane.b32.xlu1 %v6315_v27, %s7581_s14  ;;  %v5776_v45 = vcombine.low %v8712_v3, %v8689_v24  ;;  %v5771_v46 = vcombine.high %v8706_v0, %v8686_v2  ;;  %v5777_v61 = vcombine.high %v8712_v3, %v8689_v24  ;;  %v6321_v53 = vcombine.high %v8650_v36, %v8673_v25 }
 0x42c   : > { %v6314_v10 = vcombine.low %v8640_v6, %v8669_v21  ;;  %v5770_v28 = vcombine.low %v8706_v0, %v8686_v2  ;;  %v6330_v34 = vrot.slane %v6322_v29, %v7855_v4  ;;  %v6337_v8 = vrot.slane %v6323_v15, %v7855_v4 }
 0x42d   : > { %v5786_v16 = vrot.slane %v5778_v22, %v7855_v4  ;;  %v5793_v52 = vrot.slane %v5779_v9, %v7855_v4 }
 0x42e   : > { %6482 = vrot.lane.b32.xlu0 %v5772_v31, %s7579_s12 }
 0x42f   : > { %v7283_v63 = vpop.f32.mrb[34].mxu0  ;;  %6594 = vrot.lane.b32.xlu1 %v6316_v40, %s7579_s12 }
 0x430   : > { %v6338_v43 = vcombine.low %v7269_v44, %v7283_v63  ;;  %v6339_v62 = vcombine.high %v7269_v44, %v7283_v63  ;;  %v4909_v1 = vpop.f32.mrb[35].mxu0 }
 0x431   : > { %v5794_v55 = vcombine.low %v4683_v11, %v4909_v1  ;;  %v5795_v18 = vcombine.high %v4683_v11, %v4909_v1 }
 0x432   : > { %v6346_v47 = vrot.slane %v6338_v43, %v7855_v4  ;;  %v6353_v19 = vrot.slane %v6339_v62, %v7855_v4  ;;  %v7304_v38 = vpop.f32.mrb[34].mxu1  ;;  %6498 = vrot.lane.b32.xlu0 %v5773_v37, %s7580_s13 }
 0x433   : > { %v5802_v17 = vrot.slane %v5794_v55, %v7855_v4  ;;  %v5809_v26 = vrot.slane %v5795_v18, %v7855_v4  ;;  %v6354_v29 = vcombine.low %v8715_v56, %v7304_v38  ;;  %v6355_v15 = vcombine.high %v8715_v56, %v7304_v38  ;;  %v5248_v33 = vpop.f32.mrb[35].mxu1  ;;  %6610 = vrot.lane.b32.xlu1 %v6317_v57, %s7580_s13 }
 0x434   : > { %v6386_v41 = vcombine.low %v6330_v34, %v6346_v47  ;;  %v6387_v60 = vcombine.high %v6330_v34, %v6346_v47  ;;  %v6402_v44 = vcombine.low %v6337_v8, %v6353_v19  ;;  %v6403_v22 = vcombine.high %v6337_v8, %v6353_v19 }
 0x435   : > { %v5842_v9 = vcombine.low %v5786_v16, %v5802_v17  ;;  %v5843_v11 = vcombine.high %v5786_v16, %v5802_v17  ;;  %v5858_v14 = vcombine.low %v5793_v52, %v5809_v26  ;;  %v5859_v27 = vcombine.high %v5793_v52, %v5809_v26 }
 0x436   : > { %6514 = vrot.lane.b32.xlu0 %v5774_v12, %s7577_s10  ;;  %v5810_v31 = vcombine.low %v8718_v51, %v5248_v33  ;;  %v5811_v37 = vcombine.high %v8718_v51, %v5248_v33  ;;  %v8762_v57 = vrot.slane %v6386_v41, %v7865_v20  ;;  %v6401_v63 = vrot.slane %v6387_v60, %v7865_v20 }
 0x437   : > { %v7297_v40 = vpop.f32.mrb[36].mxu0  ;;  %6626 = vrot.lane.b32.xlu1 %v6318_v32, %s7577_s10  ;;  %v8766_v43 = vrot.slane %v6402_v44, %v7865_v20  ;;  %v8769_v12 = vrot.slane %v6403_v22, %v7865_v20  ;;  %v8773_v51 = vrot.slane %v5842_v9, %v7865_v20  ;;  %v5866_v34 = vrot.slane %v5858_v14, %v7865_v20 }
 0x438   : > { %v5135_v56 = vpop.f32.mrb[37].mxu0  ;;  %v8779_v8 = vrot.slane %v5859_v27, %v7865_v20  ;;  %v6369_v16 = vrot.slane %v6355_v15, %v7855_v4  ;;  %v5825_v19 = vrot.slane %v5811_v37, %v7855_v4 }
 0x43a   : > { %6530 = vrot.lane.b32.xlu0 %v5775_v13, %s7575_s29  ;;  %v5857_v13 = vrot.slane %v5843_v11, %v7865_v20 }
 0x43b   : > { %6642 = vrot.lane.b32.xlu1 %v6319_v58, %s7575_s29 }
 0x43e   : > { %6546 = vrot.lane.b32.xlu0 %v5776_v45, %s7578_s11  ;;  %v6362_v45 = vrot.slane %v6354_v29, %v7855_v4 }
 0x43f   : > { %v7311_v32 = vpop.f32.mrb[38].mxu0  ;;  %6466 = vrot.lane.b32.xlu1 %v5771_v46, %s7581_s14  ;;  %v5818_v46 = vrot.slane %v5810_v31, %v7855_v4 }
 0x440   : > { %v6370_v58 = vcombine.low %v7297_v40, %v7311_v32  ;;  %v6371_v62 = vcombine.high %v7297_v40, %v7311_v32  ;;  %v5361_v1 = vpop.f32.mrb[39].mxu0 }
 0x441   : > { %v5826_v55 = vcombine.low %v5135_v56, %v5361_v1  ;;  %v5827_v18 = vcombine.high %v5135_v56, %v5361_v1 }
 0x442   : > { %v6378_v52 = vrot.slane %v6370_v58, %v7855_v4  ;;  %v6385_v47 = vrot.slane %v6371_v62, %v7855_v4  ;;  %6562 = vrot.lane.b32.xlu0 %v5777_v61, %s7576_s9 }
 0x443   : > { %v5834_v38 = vrot.slane %v5826_v55, %v7855_v4  ;;  %v5841_v17 = vrot.slane %v5827_v18, %v7855_v4 }
 0x444   : > { %v6418_v26 = vcombine.low %v6362_v45, %v6378_v52  ;;  %v6419_v29 = vcombine.high %v6362_v45, %v6378_v52  ;;  %v6434_v15 = vcombine.low %v6369_v16, %v6385_v47  ;;  %v6435_v33 = vcombine.high %v6369_v16, %v6385_v47 }
 0x445   : > { %v5874_v41 = vcombine.low %v5818_v46, %v5834_v38  ;;  %v5875_v60 = vcombine.high %v5818_v46, %v5834_v38  ;;  %v5890_v44 = vcombine.low %v5825_v19, %v5841_v17  ;;  %v5891_v22 = vcombine.high %v5825_v19, %v5841_v17 }
 0x446   : > { %v8794_v9 = vrot.slane %v6418_v26, %v7865_v20  ;;  %v6433_v11 = vrot.slane %v6419_v29, %v7865_v20  ;;  %v6442_v4 = vrot.slane %v6434_v15, %v7865_v20  ;;  %v6449_v14 = vrot.slane %v6435_v33, %v7865_v20  ;;  %v9019_v29 = vld [vmem:[#allocation5_spill] sm:$0xff] }
 0x447   : > { %v8800_v24 = vrot.slane %v5874_v41, %v7865_v20  ;;  %v5889_v3 = vrot.slane %v5875_v60, %v7865_v20  ;;  %v5898_v61 = vrot.slane %v5890_v44, %v7865_v20  ;;  %v5905_v27 = vrot.slane %v5891_v22, %v7865_v20 }
 0x448   : > { %v6456_v40 = vcombine.low %v8769_v12, %v6449_v14  ;;  %v6451_v31 = vcombine.high %v8762_v57, %v8794_v9  ;;  %v6452_v37 = vcombine.low %v6401_v63, %v6433_v11  ;;  %v6453_v56 = vcombine.high %v6401_v63, %v6433_v11 }
 0x449   : > { %v5907_v32 = vcombine.high %v8773_v51, %v8800_v24  ;;  %v5908_v58 = vcombine.low %v5857_v13, %v5889_v3  ;;  %v6454_v62 = vcombine.low %v8766_v43, %v6442_v4  ;;  %v5909_v1 = vcombine.high %v5857_v13, %v5889_v3 }
 0x44a   : > { %6660 = vrot.lane.b32.xlu1 %v6456_v40, %s7578_s11  ;;  %6580 = vrot.lane.b32.xlu0 %v6451_v31, %s7581_s14  ;;  %v6455_v20 = vcombine.high %v8766_v43, %v6442_v4  ;;  %v5910_v55 = vcombine.low %v5866_v34, %v5898_v61  ;;  %v5911_v18 = vcombine.high %v5866_v34, %v5898_v61  ;;  %v9020_v15 = vsub.s32 1, %v9019_v29 }
 0x44b   : > { %v5912_v45 = vcombine.low %v8779_v8, %v5905_v27  ;;  %v5913_v16 = vcombine.high %v8779_v8, %v5905_v27  ;;  %v6457_v63 = vcombine.high %v8769_v12, %v6449_v14  ;;  %v6450_v52 = vcombine.low %v8762_v57, %v8794_v9 }
 0x44c   : > { %v5906_v13 = vcombine.low %v8773_v51, %v8800_v24 }
 0x44e   : > { %6596 = vrot.lane.b32.xlu0 %v6452_v37, %s7579_s12  ;;  %6468 = vrot.lane.b32.xlu1 %v5907_v32, %s7581_s14  ;;  %v9021_v32 = vsub.s32 0, %v9019_v29 }
 0x452   : > { %6612 = vrot.lane.b32.xlu0 %v6453_v56, %s7580_s13  ;;  %6484 = vrot.lane.b32.xlu1 %v5908_v58, %s7579_s12 }
 0x456   : > { %6628 = vrot.lane.b32.xlu0 %v6454_v62, %s7577_s10  ;;  %6500 = vrot.lane.b32.xlu1 %v5909_v1, %s7580_s13 }
 0x45a   : > { %6644 = vrot.lane.b32.xlu0 %v6455_v20, %s7575_s29  ;;  %6516 = vrot.lane.b32.xlu1 %v5910_v55, %s7577_s10  ;;  %s7510_s10 = scalar_lea.vmem %s8955_s26, 1024 }
 0x45b   : > { %p7511_p11 = scmp.ne.s32.totalorder %s8955_s26, %s7510_s10 }
 0x45c   : > { %v6575_v43 = vpop.permute.xlu1 %6574  ;;  %v6655_v12 = vpop.permute.xlu0 %6654 }
 0x45d   : > { %v6715_v38 = vsel %vm266_vm0, %v6042_v50, %v6575_v43  ;;  %p7512_p12 = pnand %p7511_p11, %p7659_p5 }
 0x45e   : > { %6674 = vrot.lane.b32.xlu0 %v6321_v53, %s7576_s9  ;;  %6532 = vrot.lane.b32.xlu1 %v5911_v18, %s7575_s29  ;;  %v6751_v53 = vld [vmem:[%s9007_s5] sm:$0x3] }
 0x45f   : > { %v8851_v33 = vrot.slane %v6751_v53, %v9020_v15  ;;  %v8872_v58 = vrot.slane %v6751_v53, %v9021_v32  ;;  %p7513_p13 = pneg %p7512_p12 }
 0x460   : > { %v6591_v34 = vpop.permute.xlu1 %6590  ;;  %v6671_v8 = vpop.permute.xlu0 %6670 }
 0x461   : > { %v6719_v25 = vsel %vm388_vm1, %v6715_v38, %v6591_v34 }
 0x462   : > { %6548 = vrot.lane.b32.xlu1 %v5912_v45, %s7578_s11  ;;  %s7584_s11 = smov [#allocation2]  }
 0x463   : > { %s7514_s12 = sshll.u32 %s7584_s11, 4  ;;  %s7515_s12 = int_to_ptr.vmem [resolvable:$false] %s7514_s12 }
 0x464   : > { %v6607_v47 = vpop.permute.xlu1 %6606  ;;  %v6495_v46 = vpop.permute.xlu0 %6494  ;;  %s7516_s13 = scalar_lea.vmem %s7515_s12, 2048  ;;  %p7517_p0 = scmp.lt.s32.totalorder %s8955_s26, %s7515_s12 }
 0x465   : > { %v6723_v17 = vsel %vm6690_vm2, %v6719_v25, %v6607_v47  ;;  %p7518_p1 = scmp.lt.s32.totalorder %s7516_s13, %s7510_s10 }
 0x466   : > { %6564 = vrot.lane.b32.xlu1 %v5913_v16, %s7576_s9 }
 0x467   : > { %p7519_p2 = por %p7518_p1, %p7517_p0 }
 0x468   : > { %v6623_v19 = vpop.permute.xlu1 %6622  ;;  %v6511_v36 = vpop.permute.xlu0 %6510 }
 0x469   : > { %v6727_v54 = vsel %vm6695_vm3, %v6723_v17, %v6623_v19  ;;  %p7520_p3 = pnand %p7519_p2, %p7513_p13 }
 0x46a   : > { %6676 = vrot.lane.b32.xlu1 %v6457_v63, %s7576_s9  ;;  %s8952_s9 = scalar_lea.hbm %s9008_s6, %s6943_s20 }
 0x46c   : > { %v6639_v49 = vpop.permute.xlu1 %6638  ;;  %v6527_v26 = vpop.permute.xlu0 %6526 }
 0x46d   : > { %v6731_v50 = vsel %vm6700_vm4, %v6727_v54, %v6639_v49 }
 0x46e   : > { %v6735_v41 = vsel %vm6705_vm5, %v6731_v50, %v6655_v12 }
 0x46f   : > { %v6739_v60 = vsel %vm6710_vm6, %v6735_v41, %v6671_v8 }
 0x470   : > { %v6744_v44 = vsub.f32 0.0, %v6739_v60  ;;  %v6463_v22 = vpop.permute.xlu1 %6462  ;;  %v6543_v4 = vpop.permute.xlu0 %6542 }
 0x471   : > { %v6682_v14 = vsel %vm266_vm0, %v5498_v30, %v6463_v22 }
 0x472   : > { %v6764_v11 = vsub.f32 %v6744_v44, %v8851_v33 }
 0x474   : > { %6772 = vst [vmem:[%s8858_s19 + $0x8] sm:$0xff] %v6764_v11  ;;  %v6479_v3 = vpop.permute.xlu1 %6478  ;;  %v6559_v37 = vpop.permute.xlu0 %6558 }
 0x475   : > { %v6686_v61 = vsel %vm388_vm1, %v6682_v14, %v6479_v3 }
 0x476   : > { %v6691_v27 = vsel %vm6690_vm2, %v6686_v61, %v6495_v46 }
 0x477   : > { %v6696_v40 = vsel %vm6695_vm3, %v6691_v27, %v6511_v36 }
 0x478   : > { %v6701_v31 = vsel %vm6700_vm4, %v6696_v40, %v6527_v26 }
 0x479   : > { %v6706_v56 = vsel %vm6705_vm5, %v6701_v31, %v6543_v4 }
 0x47a   : > { %v6711_v48 = vsel %vm6710_vm6, %v6706_v56, %v6559_v37 }
 0x47b   : > { %v6743_v39 = vsub.f32 0.0, %v6711_v48 }
 0x47c   : > { %v6657_v30 = vpop.permute.xlu1 %6656  ;;  %v6577_v62 = vpop.permute.xlu0 %6576 }
 0x47d   : > { %v6763_v1 = vsub.f32 %v6743_v39, %v8872_v58  ;;  %v6716_v63 = vsel %vm266_vm0, %v6178_v59, %v6577_v62 }
 0x47f   : > { %6771 = vst [vmem:[%s8858_s19] sm:$0xff] %v6763_v1 }
 0x480   : > { %v6673_v20 = vpop.permute.xlu1 %6672  ;;  %v6593_v55 = vpop.permute.xlu0 %6592 }
 0x481   : > { %v6720_v12 = vsel %vm388_vm1, %v6716_v63, %v6593_v55 }
 0x484   : > { %v6481_v18 = vpop.permute.xlu1 %6480  ;;  %v6609_v45 = vpop.permute.xlu0 %6608 }
 0x485   : > { %v6724_v34 = vsel %vm6690_vm2, %v6720_v12, %v6609_v45 }
 0x488   : > { %v6625_v16 = vpop.permute.xlu0 %6624  ;;  %v6497_v43 = vpop.permute.xlu1 %6496 }
 0x489   : > { %v6728_v8 = vsel %vm6695_vm3, %v6724_v34, %v6625_v16 }
 0x48c   : > { %v6641_v47 = vpop.permute.xlu0 %6640  ;;  %v6513_v46 = vpop.permute.xlu1 %6512 }
 0x48d   : > { %v6732_v19 = vsel %vm6700_vm4, %v6728_v8, %v6641_v47 }
 0x48e   : > { %v6736_v38 = vsel %vm6705_vm5, %v6732_v19, %v6657_v30 }
 0x48f   : > { %v6740_v36 = vsel %vm6710_vm6, %v6736_v38, %v6673_v20 }
 0x490   : > { %v6746_v25 = vsub.f32 0.0, %v6740_v36  ;;  %v6465_v7 = vpop.permute.xlu0 %6464  ;;  %v6529_v5 = vpop.permute.xlu1 %6528 }
 0x491   : > { %v6683_v59 = vsel %vm266_vm0, %v5634_v35, %v6465_v7 }
 0x492   : > { %v6766_v53 = vsub.f32 %v6746_v25, %v8851_v33  ;;  %v6687_v17 = vsel %vm388_vm1, %v6683_v59, %v6481_v18 }
 0x493   : > { %v6692_v54 = vsel %vm6690_vm2, %v6687_v17, %v6497_v43 }
 0x494   : > { %6774 = vst [vmem:[%s8858_s19 + $0x18] sm:$0xff] %v6766_v53  ;;  %v6697_v49 = vsel %vm6695_vm3, %v6692_v54, %v6513_v46  ;;  %v6545_v50 = vpop.permute.xlu1 %6544 }
 0x495   : > { %v6702_v26 = vsel %vm6700_vm4, %v6697_v49, %v6529_v5 }
 0x496   : > { %v6707_v29 = vsel %vm6705_vm5, %v6702_v26, %v6545_v50 }
 0x498   : > { %v6561_v15 = vpop.permute.xlu1 %6560 }
 0x499   : > { %v6712_v23 = vsel %vm6710_vm6, %v6707_v29, %v6561_v15 }
 0x49a   : > { %v6745_v42 = vsub.f32 0.0, %v6712_v23 }
 0x49c   : > { %v6659_v41 = vpop.permute.xlu0 %6658  ;;  %v6765_v35 = vsub.f32 %v6745_v42, %v8872_v58 }
 0x49d   : > { %v6579_v60 = vpop.permute.xlu1 %6578 }
 0x49e   : > { %6773 = vst [vmem:[%s8858_s19 + $0x10] sm:$0xff] %v6765_v35  ;;  %v6717_v12 = vsel %vm266_vm0, %v6314_v10, %v6579_v60 }
 0x4a0   : > { %v6483_v44 = vpop.permute.xlu0 %6482 }
 0x4a1   : > { %v6595_v22 = vpop.permute.xlu1 %6594 }
 0x4a2   : > { %v6721_v34 = vsel %vm388_vm1, %v6717_v12, %v6595_v22 }
 0x4a4   : > { %v6499_v11 = vpop.permute.xlu0 %6498 }
 0x4a5   : > { %v6611_v4 = vpop.permute.xlu1 %6610 }
 0x4a6   : > { %v6725_v8 = vsel %vm6690_vm2, %v6721_v34, %v6611_v4 }
 0x4a8   : > { %v6515_v14 = vpop.permute.xlu0 %6514 }
 0x4a9   : > { %v6627_v3 = vpop.permute.xlu1 %6626 }
 0x4aa   : > { %v6729_v47 = vsel %vm6695_vm3, %v6725_v8, %v6627_v3 }
 0x4ac   : > { %v6531_v61 = vpop.permute.xlu0 %6530 }
 0x4ad   : > { %v6643_v27 = vpop.permute.xlu1 %6642 }
 0x4ae   : > { %v6733_v38 = vsel %vm6700_vm4, %v6729_v47, %v6643_v27 }
 0x4af   : > { %v6737_v25 = vsel %vm6705_vm5, %v6733_v38, %v6659_v41 }
 0x4b0   : > { %v6547_v31 = vpop.permute.xlu0 %6546 }
 0x4b1   : > { %v6467_v40 = vpop.permute.xlu1 %6466 }
 0x4b2   : > { %v6684_v37 = vsel %vm266_vm0, %v5770_v28, %v6467_v40 }
 0x4b3   : > { %v6688_v56 = vsel %vm388_vm1, %v6684_v37, %v6483_v44 }
 0x4b4   : > { %v6693_v32 = vsel %vm6690_vm2, %v6688_v56, %v6499_v11  ;;  %v6563_v62 = vpop.permute.xlu0 %6562 }
 0x4b5   : > { %v6698_v48 = vsel %vm6695_vm3, %v6693_v32, %v6515_v14 }
 0x4b6   : > { %v6703_v39 = vsel %vm6700_vm4, %v6698_v48, %v6531_v61 }
 0x4b7   : > { %v6708_v30 = vsel %vm6705_vm5, %v6703_v39, %v6547_v31 }
 0x4b8   : > { %v6713_v1 = vsel %vm6710_vm6, %v6708_v30, %v6563_v62 }
 0x4b9   : > { %v6747_v20 = vsub.f32 0.0, %v6713_v1 }
 0x4bb   : > { %v6767_v55 = vsub.f32 %v6747_v20, %v8872_v58 }
 0x4bc   : > { %v6661_v18 = vpop.permute.xlu1 %6660  ;;  %v6581_v2 = vpop.permute.xlu0 %6580 }
 0x4bd   : > { %6775 = vst [vmem:[%s8858_s19 + $0x20] sm:$0xff] %v6767_v55  ;;  %v6718_v17 = vsel %vm266_vm0, %v6450_v52, %v6581_v2 }
 0x4c0   : > { %v6469_v0 = vpop.permute.xlu1 %6468  ;;  %v6597_v28 = vpop.permute.xlu0 %6596 }
 0x4c1   : > { %v6685_v21 = vsel %vm266_vm0, %v5906_v13, %v6469_v0  ;;  %v6722_v49 = vsel %vm388_vm1, %v6718_v17, %v6597_v28 }
 0x4c4   : > { %v6485_v45 = vpop.permute.xlu1 %6484  ;;  %v6613_v16 = vpop.permute.xlu0 %6612 }
 0x4c5   : > { %v6689_v10 = vsel %vm388_vm1, %v6685_v21, %v6485_v45  ;;  %v6726_v24 = vsel %vm6690_vm2, %v6722_v49, %v6613_v16 }
 0x4c8   : > { %v6501_v63 = vpop.permute.xlu1 %6500  ;;  %v6629_v43 = vpop.permute.xlu0 %6628 }
 0x4c9   : > { %v6694_v54 = vsel %vm6690_vm2, %v6689_v10, %v6501_v63  ;;  %v6730_v50 = vsel %vm6695_vm3, %v6726_v24, %v6629_v43 }
 0x4cc   : > { %v6517_v46 = vpop.permute.xlu1 %6516  ;;  %v6645_v19 = vpop.permute.xlu0 %6644 }
 0x4cd   : > { %v6699_v51 = vsel %vm6695_vm3, %v6694_v54, %v6517_v46  ;;  %v6734_v52 = vsel %vm6700_vm4, %v6730_v50, %v6645_v19 }
 0x4ce   : > { %v6738_v42 = vsel %vm6705_vm5, %v6734_v52, %v6661_v18 }
 0x4d0   : > { %v6533_v36 = vpop.permute.xlu1 %6532  ;;  %v6675_v7 = vpop.permute.xlu0 %6674 }
 0x4d1   : > { %v6741_v5 = vsel %vm6710_vm6, %v6737_v25, %v6675_v7  ;;  %v6704_v13 = vsel %vm6700_vm4, %v6699_v51, %v6533_v36 }
 0x4d2   : > { %v6748_v6 = vsub.f32 0.0, %v6741_v5 }
 0x4d4   : > { %v6768_v59 = vsub.f32 %v6748_v6, %v8851_v33  ;;  %v6549_v53 = vpop.permute.xlu1 %6548 }
 0x4d5   : > { %v6709_v57 = vsel %vm6705_vm5, %v6704_v13, %v6549_v53 }
 0x4d6   : > { %6776 = vst [vmem:[%s8858_s19 + $0x28] sm:$0xff] %v6768_v59 }
 0x4d8   : > { %v6565_v9 = vpop.permute.xlu1 %6564 }
 0x4d9   : > { %v6714_v26 = vsel %vm6710_vm6, %v6709_v57, %v6565_v9 }
 0x4da   : > { %v6749_v29 = vsub.f32 0.0, %v6714_v26 }
 0x4dc   : > { %v6769_v15 = vsub.f32 %v6749_v29, %v8872_v58  ;;  %v6677_v23 = vpop.permute.xlu1 %6676 }
 0x4dd   : > { %v6742_v41 = vsel %vm6710_vm6, %v6738_v42, %v6677_v23 }
 0x4de   : > { %6777 = vst [vmem:[%s8858_s19 + $0x30] sm:$0xff] %v6769_v15  ;;  %v6750_v35 = vsub.f32 0.0, %v6742_v41 }
 0x4e0   : > { %v6770_v60 = vsub.f32 %v6750_v35, %v8851_v33 }
 0x4e2   : > { %6778 = vst [vmem:[%s8858_s19 + $0x38] sm:$0xff] %v6770_v60 }
 0x4e3   : > { %7523 = shalt.err (!%p7520_p3)
}
 0x4e4   : > { %s7524_s15 = scalar_lea.hbm %s8952_s9, 1024  ;;  %s7528_s18 = scalar_lea.hbm %s9008_s6, 2048 }
 0x4e5   : > { %p7525_p4 = scmp.ne.s32.totalorder %s8952_s9, %s7524_s15  ;;  %p7529_p9 = scmp.lt.u32.totalorder %s8952_s9, %s9008_s6 }
 0x4e6   : > { %p7530_p10 = scmp.lt.u32.totalorder %s7528_s18, %s7524_s15  ;;  %p7532_p12 = scmp.lt.u32.totalorder %s7524_s15, %s8952_s9 }
 0x4e7   : > { %p7526_p7 = pnand %p7525_p4, %p7659_p5 }
 0x4e8   : > { %p7531_p11 = por %p7530_p10, %p7529_p9 }
 0x4e9   : > { %p7527_p8 = pneg %p7526_p7 }
 0x4ea   : > { %p7533_p13 = por %p7532_p12, %p7531_p11 }
 0x4ec   : > { %p7534_p0 = pnand %p7533_p13, %p7527_p8 }
 0x4ee   : > { %7537 = shalt.err (!%p7534_p0)
}
 0x4ef   : > { %s7585_s28 = smov 256  }
 0x4f0   : > { %7452 = dma.vmem_to_hbm [thread:$0]  (%p7659_p5), %s8955_s26, 1024, %s8952_s9, %s8960_s25, %s7585_s28, %s7585_s28, %s7581_s14  }
 0x4f1 PF: > { %p7458_p1 = scmp.ge.s32.totalorder %s7572_s24, 2  ;;  %s6809_s29 = sand.u32 1, %s7560_s21  }
 0x4f2   : > { %s6810_s10 = scalar_lea.sflag [#allocation3], %s6809_s29 }
 0x4f3   : > { %p7455_p2 = pnand %p7458_p1, %p7663_p6 }
 0x4f5   : > { %7555 = dma.done.wait (!%p7455_p2), %s6810_s10, 1024  }
 0x4f6   : > { %7557 = vsyncadd (!%p7455_p2), %s6810_s10, 4294966272  ;;  %p16_p3 = scmp.ge.s32.totalorder %s7646_s27, 4   ;;  %s9022_s21 = smov %s7564_s22 }
 0x4f7   : > { %s9023_s22 = smov %s7568_s23  ;;  %s9024_s23 = smov %s7657_s30 }
 0x4f8   : > { %s9025_s24 = smov %s7646_s27  ;;  %18 = sbr.rel (!%p16_p3) target bundleno = 3 (0x3), region = 79 }
 0x4ff   :  { %6815 = vsyncpa [#allocation3], 1 }
 0x500   :  { %6817 = vsyncpa [#allocation3 + $0x1], 1 }

</bundles_post_ra>
